<compile_context>
chip_gen: v7x
topology: tpu7x:2x2x1
jax: 0.10.0
libtpu: 0.0.40
codegen_flags: <defaults>
</compile_context>

<pallas_src>
import functools

import jax
import jax.numpy as jnp
import numpy as np
from jax.experimental import pallas as pl
from jax.experimental.pallas import tpu as pltpu

BN_EPS = 1e-5
NEG_BIG = -1e30


# ----------------------------------------------------------------------------- fused kernel
def _milp_gnn_fused_kernel(n_layers, *refs):
    """n_layers x (BatchNorm -> bipartite GraphConv(mean) -> ReLU)  +  max/attention pooling."""
    (x_var_ref, x_cstr_ref, a_vc_ref, a_cv_ref,
     m_var_ref, m_var_t_ref, m_cstr_ref, m_cstr_t_ref) = refs[:8]
    layer_refs = refs[8:8 + 8 * n_layers]
    (w1v_ref, b1v_ref, w2v_ref, b2v_ref,
     w1c_ref, b1c_ref, w2c_ref, b2c_ref) = refs[8 + 8 * n_layers:8 + 8 * n_layers + 8]
    out_ref = refs[8 + 8 * n_layers + 8]

    xv = x_var_ref[...]                 # (Nv, Fv)
    xc = x_cstr_ref[...]                # (Nc, Fc)
    a_vc = a_vc_ref[...]                # (Nv, Nc) bf16 — loaded from HBM exactly once
    a_cv = a_cv_ref[...]                # (Nc, Nv) bf16

    # -------- fused GNN stack: activations stay in VMEM/vregs between layers --------
    for l in range(n_layers):
        (bn_g_v, bn_b_v, bn_g_c, bn_b_c,
         w_cat_v, bias_v, w_cat_c, bias_c) = layer_refs[8 * l:8 * (l + 1)]

        # tg.nn.BatchNorm (training mode: batch stats, biased variance), kept in f32.
        mu_v = jnp.mean(xv, axis=0, keepdims=True)
        var_v = jnp.mean((xv - mu_v) ** 2, axis=0, keepdims=True)
        xv_n = (xv - mu_v) * jax.lax.rsqrt(var_v + BN_EPS) * bn_g_v[...] + bn_b_v[...]
        mu_c = jnp.mean(xc, axis=0, keepdims=True)
        var_c = jnp.mean((xc - mu_c) ** 2, axis=0, keepdims=True)
        xc_n = (xc - mu_c) * jax.lax.rsqrt(var_c + BN_EPS) * bn_g_c[...] + bn_b_c[...]

        # GraphConv(aggr='mean') message passing: dominant matmuls run with bf16 operands
        # on the MXU, f32 accumulation.
        aggr_v = jnp.dot(a_vc, xc_n.astype(a_vc.dtype),
                         preferred_element_type=jnp.float32)          # (Nv, Fc)
        aggr_c = jnp.dot(a_cv, xv_n.astype(a_cv.dtype),
                         preferred_element_type=jnp.float32)          # (Nc, Fv)

        # Fused output transform (one MXU op per direction instead of two tiny ones):
        #   out = [aggr | x_dst] @ [[W_rel],[W_root]] + b_rel   (lin_root has no bias in PyG)
        xv = jnp.maximum(
            jnp.dot(jnp.concatenate([aggr_v, xv_n], axis=1), w_cat_v[...],
                    preferred_element_type=jnp.float32) + bias_v[...], 0.0)
        xc = jnp.maximum(
            jnp.dot(jnp.concatenate([aggr_c, xc_n], axis=1), w_cat_c[...],
                    preferred_element_type=jnp.float32) + bias_c[...], 0.0)

    Hv = xv.shape[1]
    Hc = xc.shape[1]
    mv = m_var_ref[...]                 # (Nv, B) one-hot graph membership
    mc = m_cstr_ref[...]                # (Nc, B)
    mv_t = m_var_t_ref[...]             # (B, Nv)
    mc_t = m_cstr_t_ref[...]            # (B, Nc)
    n_graphs = mv.shape[1]
    neg = jnp.float32(NEG_BIG)

    # -------- attention gate scores (Linear -> ReLU -> Linear), once for all nodes --------
    hv = jnp.maximum(jnp.dot(xv, w1v_ref[...], preferred_element_type=jnp.float32)
                     + b1v_ref[...], 0.0)
    sv = jnp.dot(hv, w2v_ref[...], preferred_element_type=jnp.float32) + b2v_ref[...]   # (Nv,1)
    hc = jnp.maximum(jnp.dot(xc, w1c_ref[...], preferred_element_type=jnp.float32)
                     + b1c_ref[...], 0.0)
    sc = jnp.dot(hc, w2c_ref[...], preferred_element_type=jnp.float32) + b2c_ref[...]   # (Nc,1)

    # -------- GlobalAttention: segment softmax vectorised over graphs, sums on the MXU -----
    def seg_attention(x, s, m, m_t):
        sm = jnp.where(m > 0, s, neg)                            # (N, B) masked scores
        smax = jnp.max(sm, axis=0, keepdims=True)                # (1, B) per-graph max
        p = jnp.exp(sm - smax) * m                               # (N, B), exp runs once
        q = jnp.sum(p, axis=1, keepdims=True)                    # (N, 1) (nodes are one-hot)
        num = jnp.dot(m_t, q * x, preferred_element_type=jnp.float32)   # (B, H) MXU segment-sum
        den = jnp.dot(m_t, q, preferred_element_type=jnp.float32)       # (B, 1)
        # empty-graph guard: den==0 -> attention embedding 0 instead of NaN
        return num * pl.reciprocal(jnp.maximum(den, 1e-12), approx=True)

    att_v = seg_attention(xv, sv, mv, mv_t)                      # (B, Hv)
    att_c = seg_attention(xc, sc, mc, mc_t)                      # (B, Hc)

    # -------- global_max_pool: small static per-graph masked reduce (B is tiny) --------
    cnt_v = jnp.sum(mv, axis=0, keepdims=True)                   # (1, B)
    cnt_c = jnp.sum(mc, axis=0, keepdims=True)
    max_v_rows, max_c_rows = [], []
    for b in range(n_graphs):
        mx_v = jnp.max(jnp.where(mv[:, b:b + 1] > 0, xv, neg), axis=0, keepdims=True)
        max_v_rows.append(jnp.where(cnt_v[:, b:b + 1] > 0, mx_v, 0.0))   # empty-graph guard
        mx_c = jnp.max(jnp.where(mc[:, b:b + 1] > 0, xc, neg), axis=0, keepdims=True)
        max_c_rows.append(jnp.where(cnt_c[:, b:b + 1] > 0, mx_c, 0.0))
    max_v = jnp.concatenate(max_v_rows, axis=0)                  # (B, Hv)
    max_c = jnp.concatenate(max_c_rows, axis=0)                  # (B, Hc)

    # torch.cat([max_var, max_cstr, att_var, att_cstr], dim=-1)
    out_ref[...] = jnp.concatenate([max_v, max_c, att_v, att_c], axis=1)


# ----------------------------------------------------------------------------- wrapper
def _vmem_spec():
    return pl.BlockSpec(memory_space=pltpu.MemorySpace.VMEM)


def milp_gnn_fused(x_var, x_cstr, a_vc, a_cv, m_var, m_cstr, layer_params, pool_params):
    Nv, Nc = x_var.shape[0], x_cstr.shape[0]
    B = m_var.shape[1]
    Hv = layer_params[-1]["w_cat_v"].shape[1]
    Hc = layer_params[-1]["w_cat_c"].shape[1]
    n_layers = len(layer_params)

    args = [x_var, x_cstr, a_vc, a_cv, m_var, m_var.T, m_cstr, m_cstr.T]
    for lp in layer_params:
        args += [lp["gamma_v"], lp["beta_v"], lp["gamma_c"], lp["beta_c"],
                 lp["w_cat_v"], lp["b_v"], lp["w_cat_c"], lp["b_c"]]
    args += [pool_params[k] for k in
             ("w1v", "b1v", "w2v", "b2v", "w1c", "b1c", "w2c", "b2c")]

    out_shape = jax.ShapeDtypeStruct((B, 2 * (Hv + Hc)), jnp.float32)

    # Advisory cost estimate so XLA can schedule the glue around the fused custom call.
    flops = 0
    for lp in layer_params:
        kv, hv_l = lp["w_cat_v"].shape
        kc, hc_l = lp["w_cat_c"].shape
        fv_l = lp["gamma_v"].shape[1]
        fc_l = lp["gamma_c"].shape[1]
        flops += 2 * Nv * Nc * fc_l + 2 * Nc * Nv * fv_l          # message passing
        flops += 2 * Nv * kv * hv_l + 2 * Nc * kc * hc_l          # fused output transform
    flops += 2 * Nv * Hv * (Hv // 2) + 2 * Nv * (Hv // 2)         # var gate MLP
    flops += 2 * Nc * Hc * (Hc // 2) + 2 * Nc * (Hc // 2)         # cstr gate MLP
    flops += 2 * B * Nv * Hv + 2 * B * Nc * Hc                    # attention segment sums
    transcendentals = B * (Nv + Nc) + 2 * n_layers * (Hv + Hc)
    bytes_accessed = sum(int(a.size) * a.dtype.itemsize for a in args) + int(out_shape.size) * 4

    # Scoped VMEM: above the 16 MiB (v5e) / 32 MiB (v6e,v7x) defaults, below v7x's 64 MiB.
    vmem_limit = int(min(max(4 * bytes_accessed, 32 * 1024 * 1024), 56 * 1024 * 1024))

    return pl.pallas_call(
        functools.partial(_milp_gnn_fused_kernel, n_layers),
        out_shape=out_shape,
        in_specs=[_vmem_spec() for _ in args],
        out_specs=_vmem_spec(),
        compiler_params=pltpu.CompilerParams(vmem_limit_bytes=vmem_limit),
        cost_estimate=pl.CostEstimate(flops=int(flops),
                                      transcendentals=int(transcendentals),
                                      bytes_accessed=int(bytes_accessed)),
    )(*args)


def milp_gnn_forward(var_feats, cstr_feats, edge_index, edge_attr,
                     var_batch, cstr_batch, n_graphs, params):
    Nv = var_feats.shape[0]
    Nc = cstr_feats.shape[0]
    src_c = edge_index[0]     # constraint indices (source for node_gnn)
    dst_v = edge_index[1]     # variable indices   (target for node_gnn)

    # Glue: densify the sparse graph into mean-normalised weighted adjacency matrices.
    # Normalisation in f32, storage in bf16 for the MXU (f32 accumulation in-kernel).
    a_vc = jnp.zeros((Nv, Nc), jnp.float32).at[dst_v, src_c].add(edge_attr)
    deg_v = jnp.zeros((Nv,), jnp.float32).at[dst_v].add(1.0)
    a_vc = (a_vc / jnp.maximum(deg_v, 1.0)[:, None]).astype(jnp.bfloat16)

    a_cv = jnp.zeros((Nc, Nv), jnp.float32).at[src_c, dst_v].add(edge_attr)
    deg_c = jnp.zeros((Nc,), jnp.float32).at[src_c].add(1.0)
    a_cv = (a_cv / jnp.maximum(deg_c, 1.0)[:, None]).astype(jnp.bfloat16)

    # Glue: one-hot graph-membership masks (node -> graph).
    m_var = (var_batch[:, None] == jnp.arange(n_graphs)[None, :]).astype(jnp.float32)
    m_cstr = (cstr_batch[:, None] == jnp.arange(n_graphs)[None, :]).astype(jnp.float32)

    return milp_gnn_fused(var_feats, cstr_feats, a_vc, a_cv, m_var, m_cstr,
                          params["layers"], params["pool"])


# ----------------------------------------------------------------------------- params
def linear_params(key, fan_in, fan_out, bias=True):
    """PyTorch nn.Linear-style uniform(-1/sqrt(fan_in), 1/sqrt(fan_in)); W stored (in, out)."""
    kw, kb = jax.random.split(key)
    bound = 1.0 / np.sqrt(fan_in)
    w = jax.random.uniform(kw, (fan_in, fan_out), jnp.float32, -bound, bound)
    if not bias:
        return w
    b = jax.random.uniform(kb, (1, fan_out), jnp.float32, -bound, bound)
    return w, b


def init_gnn_layer_params(key, in_dim, out_dim):
    Fv, Fc = in_dim
    Hv, Hc = out_dim
    k0, k1, k2, k3 = jax.random.split(key, 4)
    # node_gnn = GraphConv(in_channels=(Fc, Fv), out_channels=Hv)
    w_rel_v, b_v = linear_params(k0, Fc, Hv)
    w_root_v = linear_params(k1, Fv, Hv, bias=False)
    # cstr_gnn = GraphConv(in_channels=(Fv, Fc), out_channels=Hc)
    w_rel_c, b_c = linear_params(k2, Fv, Hc)
    w_root_c = linear_params(k3, Fc, Hc, bias=False)
    return dict(
        gamma_v=jnp.ones((1, Fv), jnp.float32), beta_v=jnp.zeros((1, Fv), jnp.float32),
        gamma_c=jnp.ones((1, Fc), jnp.float32), beta_c=jnp.zeros((1, Fc), jnp.float32),
        # fused output transform: rows [0:F_src] = lin_rel, rows [F_src:] = lin_root
        w_cat_v=jnp.concatenate([w_rel_v, w_root_v], axis=0), b_v=b_v,
        w_cat_c=jnp.concatenate([w_rel_c, w_root_c], axis=0), b_c=b_c,
    )


# ----------------------------------------------------------------------------- main
if __name__ == "__main__":
    key = jax.random.PRNGKey(0)
    hidden_dim = (16, 8)
    n_gnn_layers = 3
    n_graphs = 2
    nv_per = [7, 5]          # variable nodes per graph
    nc_per = [6, 4]          # constraint nodes per graph
    e_per = [18, 12]         # edges per graph
    Nv, Nc = sum(nv_per), sum(nc_per)

    k_vf, k_cf, k_e, k_w, k_p, key = jax.random.split(key, 6)
    var_feats = jax.random.normal(k_vf, (Nv, 9), jnp.float32)
    cstr_feats = jax.random.normal(k_cf, (Nc, 1), jnp.float32)

    # build bipartite edges within each graph: row0 = cstr index, row1 = var index
    edges = []
    v_off, c_off = 0, 0
    ekeys = jax.random.split(k_e, n_graphs)
    for g in range(n_graphs):
        kc, kv = jax.random.split(ekeys[g])
        src_c = jax.random.randint(kc, (e_per[g],), 0, nc_per[g]) + c_off
        dst_v = jax.random.randint(kv, (e_per[g],), 0, nv_per[g]) + v_off
        edges.append(jnp.stack([src_c, dst_v], axis=0))
        v_off += nv_per[g]
        c_off += nc_per[g]
    edge_index = jnp.concatenate(edges, axis=1).astype(jnp.int32)            # (2, 30)
    edge_attr = jax.random.normal(k_w, (edge_index.shape[1],), jnp.float32)  # (30,)

    var_batch = jnp.concatenate(
        [jnp.full((n,), g, jnp.int32) for g, n in enumerate(nv_per)])        # (Nv,)
    cstr_batch = jnp.concatenate(
        [jnp.full((n,), g, jnp.int32) for g, n in enumerate(nc_per)])        # (Nc,)

    # parameters (deterministic, synthetic)
    layer_dims = [((9, 1), hidden_dim)] + [(hidden_dim, hidden_dim)] * (n_gnn_layers - 1)
    pkeys = jax.random.split(k_p, n_gnn_layers + 4)
    layer_params = [init_gnn_layer_params(pkeys[i], *layer_dims[i])
                    for i in range(n_gnn_layers)]
    Hv, Hc = hidden_dim
    w1v, b1v = linear_params(pkeys[-4], Hv, Hv // 2)
    w2v, b2v = linear_params(pkeys[-3], Hv // 2, 1)
    w1c, b1c = linear_params(pkeys[-2], Hc, Hc // 2)
    w2c, b2c = linear_params(pkeys[-1], Hc // 2, 1)
    pool_params = dict(w1v=w1v, b1v=b1v, w2v=w2v, b2v=b2v,
                       w1c=w1c, b1c=b1c, w2c=w2c, b2c=b2c)
    params = {"layers": layer_params, "pool": pool_params}

    out = milp_gnn_forward(var_feats, cstr_feats, edge_index, edge_attr,
                           var_batch, cstr_batch, n_graphs, params)
    out = jax.block_until_ready(out)

    assert out.shape == (n_graphs, 2 * (Hv + Hc)), out.shape
    assert bool(jnp.all(jnp.isfinite(out)))
    # TODO(synk): BatchNorm running-statistic updates (training-time state) are not modeled;
    # normalization uses batch statistics exactly as torch training-mode forward does.
    print("KERNEL_OK")
</pallas_src>

<mosaic_0001>
module attributes {stable_mosaic.version = 11 : i64} {
  func.func @_milp_gnn_fused_kernel(%arg0: memref<12x9xf32, #tpu.memory_space<vmem>>, %arg1: memref<10x1xf32, #tpu.memory_space<vmem>>, %arg2: memref<12x10xbf16, #tpu.memory_space<vmem>>, %arg3: memref<10x12xbf16, #tpu.memory_space<vmem>>, %arg4: memref<12x2xf32, #tpu.memory_space<vmem>>, %arg5: memref<2x12xf32, #tpu.memory_space<vmem>>, %arg6: memref<10x2xf32, #tpu.memory_space<vmem>>, %arg7: memref<2x10xf32, #tpu.memory_space<vmem>>, %arg8: memref<1x9xf32, #tpu.memory_space<vmem>>, %arg9: memref<1x9xf32, #tpu.memory_space<vmem>>, %arg10: memref<1x1xf32, #tpu.memory_space<vmem>>, %arg11: memref<1x1xf32, #tpu.memory_space<vmem>>, %arg12: memref<10x16xf32, #tpu.memory_space<vmem>>, %arg13: memref<1x16xf32, #tpu.memory_space<vmem>>, %arg14: memref<10x8xf32, #tpu.memory_space<vmem>>, %arg15: memref<1x8xf32, #tpu.memory_space<vmem>>, %arg16: memref<1x16xf32, #tpu.memory_space<vmem>>, %arg17: memref<1x16xf32, #tpu.memory_space<vmem>>, %arg18: memref<1x8xf32, #tpu.memory_space<vmem>>, %arg19: memref<1x8xf32, #tpu.memory_space<vmem>>, %arg20: memref<24x16xf32, #tpu.memory_space<vmem>>, %arg21: memref<1x16xf32, #tpu.memory_space<vmem>>, %arg22: memref<24x8xf32, #tpu.memory_space<vmem>>, %arg23: memref<1x8xf32, #tpu.memory_space<vmem>>, %arg24: memref<1x16xf32, #tpu.memory_space<vmem>>, %arg25: memref<1x16xf32, #tpu.memory_space<vmem>>, %arg26: memref<1x8xf32, #tpu.memory_space<vmem>>, %arg27: memref<1x8xf32, #tpu.memory_space<vmem>>, %arg28: memref<24x16xf32, #tpu.memory_space<vmem>>, %arg29: memref<1x16xf32, #tpu.memory_space<vmem>>, %arg30: memref<24x8xf32, #tpu.memory_space<vmem>>, %arg31: memref<1x8xf32, #tpu.memory_space<vmem>>, %arg32: memref<16x8xf32, #tpu.memory_space<vmem>>, %arg33: memref<1x8xf32, #tpu.memory_space<vmem>>, %arg34: memref<8x1xf32, #tpu.memory_space<vmem>>, %arg35: memref<1x1xf32, #tpu.memory_space<vmem>>, %arg36: memref<8x4xf32, #tpu.memory_space<vmem>>, %arg37: memref<1x4xf32, #tpu.memory_space<vmem>>, %arg38: memref<4x1xf32, #tpu.memory_space<vmem>>, %arg39: memref<1x1xf32, #tpu.memory_space<vmem>>, %arg40: memref<2x48xf32, #tpu.memory_space<vmem>>) attributes {dimension_semantics = [], scalar_prefetch = 0 : i64, scratch_operands = 0 : i64, tpu.core_type = #tpu.core_type<tc>} {
    %c0 = arith.constant 0 : index
    %c0_0 = arith.constant 0 : index
    %0 = vector.load %arg0[%c0, %c0_0] : memref<12x9xf32, #tpu.memory_space<vmem>>, vector<12x9xf32>
    %c0_1 = arith.constant 0 : index
    %c0_2 = arith.constant 0 : index
    %1 = vector.load %arg1[%c0_1, %c0_2] : memref<10x1xf32, #tpu.memory_space<vmem>>, vector<10x1xf32>
    %c0_3 = arith.constant 0 : index
    %c0_4 = arith.constant 0 : index
    %2 = vector.load %arg2[%c0_3, %c0_4] : memref<12x10xbf16, #tpu.memory_space<vmem>>, vector<12x10xbf16>
    %c0_5 = arith.constant 0 : index
    %c0_6 = arith.constant 0 : index
    %3 = vector.load %arg3[%c0_5, %c0_6] : memref<10x12xbf16, #tpu.memory_space<vmem>>, vector<10x12xbf16>
    %cst = arith.constant dense<0.000000e+00> : vector<9xf32>
    %4 = vector.multi_reduction <add>, %0, %cst [0] : vector<12x9xf32> to vector<9xf32>
    %5 = vector.shape_cast %4 : vector<9xf32> to vector<1x9xf32>
    %cst_7 = arith.constant 1.200000e+01 : f32
    %6 = vector.broadcast %cst_7 : f32 to vector<1x9xf32>
    %7 = arith.divf %5, %6 : vector<1x9xf32>
    %8 = vector.broadcast %7 : vector<1x9xf32> to vector<12x9xf32>
    %9 = arith.subf %0, %8 : vector<12x9xf32>
    %10 = arith.mulf %9, %9 : vector<12x9xf32>
    %cst_8 = arith.constant dense<0.000000e+00> : vector<9xf32>
    %11 = vector.multi_reduction <add>, %10, %cst_8 [0] : vector<12x9xf32> to vector<9xf32>
    %12 = vector.shape_cast %11 : vector<9xf32> to vector<1x9xf32>
    %cst_9 = arith.constant 1.200000e+01 : f32
    %13 = vector.broadcast %cst_9 : f32 to vector<1x9xf32>
    %14 = arith.divf %12, %13 : vector<1x9xf32>
    %15 = vector.broadcast %7 : vector<1x9xf32> to vector<12x9xf32>
    %16 = arith.subf %0, %15 : vector<12x9xf32>
    %cst_10 = arith.constant 9.99999974E-6 : f32
    %17 = vector.broadcast %cst_10 : f32 to vector<1x9xf32>
    %18 = arith.addf %14, %17 : vector<1x9xf32>
    %19 = math.rsqrt %18 : vector<1x9xf32>
    %20 = vector.broadcast %19 : vector<1x9xf32> to vector<12x9xf32>
    %21 = arith.mulf %16, %20 : vector<12x9xf32>
    %c0_11 = arith.constant 0 : index
    %c0_12 = arith.constant 0 : index
    %22 = vector.load %arg8[%c0_11, %c0_12] : memref<1x9xf32, #tpu.memory_space<vmem>>, vector<1x9xf32>
    %23 = vector.broadcast %22 : vector<1x9xf32> to vector<12x9xf32>
    %24 = arith.mulf %21, %23 : vector<12x9xf32>
    %c0_13 = arith.constant 0 : index
    %c0_14 = arith.constant 0 : index
    %25 = vector.load %arg9[%c0_13, %c0_14] : memref<1x9xf32, #tpu.memory_space<vmem>>, vector<1x9xf32>
    %26 = vector.broadcast %25 : vector<1x9xf32> to vector<12x9xf32>
    %27 = arith.addf %24, %26 : vector<12x9xf32>
    %cst_15 = arith.constant dense<0.000000e+00> : vector<1xf32>
    %28 = vector.multi_reduction <add>, %1, %cst_15 [0] : vector<10x1xf32> to vector<1xf32>
    %29 = vector.shape_cast %28 : vector<1xf32> to vector<1x1xf32>
    %cst_16 = arith.constant 1.000000e+01 : f32
    %30 = vector.broadcast %cst_16 : f32 to vector<1x1xf32>
    %31 = arith.divf %29, %30 : vector<1x1xf32>
    %32 = vector.broadcast %31 : vector<1x1xf32> to vector<10x1xf32>
    %33 = arith.subf %1, %32 : vector<10x1xf32>
    %34 = arith.mulf %33, %33 : vector<10x1xf32>
    %cst_17 = arith.constant dense<0.000000e+00> : vector<1xf32>
    %35 = vector.multi_reduction <add>, %34, %cst_17 [0] : vector<10x1xf32> to vector<1xf32>
    %36 = vector.shape_cast %35 : vector<1xf32> to vector<1x1xf32>
    %cst_18 = arith.constant 1.000000e+01 : f32
    %37 = vector.broadcast %cst_18 : f32 to vector<1x1xf32>
    %38 = arith.divf %36, %37 : vector<1x1xf32>
    %39 = vector.broadcast %31 : vector<1x1xf32> to vector<10x1xf32>
    %40 = arith.subf %1, %39 : vector<10x1xf32>
    %cst_19 = arith.constant 9.99999974E-6 : f32
    %41 = vector.broadcast %cst_19 : f32 to vector<1x1xf32>
    %42 = arith.addf %38, %41 : vector<1x1xf32>
    %43 = math.rsqrt %42 : vector<1x1xf32>
    %44 = vector.broadcast %43 : vector<1x1xf32> to vector<10x1xf32>
    %45 = arith.mulf %40, %44 : vector<10x1xf32>
    %c0_20 = arith.constant 0 : index
    %c0_21 = arith.constant 0 : index
    %46 = vector.load %arg10[%c0_20, %c0_21] : memref<1x1xf32, #tpu.memory_space<vmem>>, vector<1x1xf32>
    %47 = vector.broadcast %46 : vector<1x1xf32> to vector<10x1xf32>
    %48 = arith.mulf %45, %47 : vector<10x1xf32>
    %c0_22 = arith.constant 0 : index
    %c0_23 = arith.constant 0 : index
    %49 = vector.load %arg11[%c0_22, %c0_23] : memref<1x1xf32, #tpu.memory_space<vmem>>, vector<1x1xf32>
    %50 = vector.broadcast %49 : vector<1x1xf32> to vector<10x1xf32>
    %51 = arith.addf %48, %50 : vector<10x1xf32>
    %52 = arith.truncf %51 : vector<10x1xf32> to vector<10x1xbf16>
    %cst_24 = arith.constant dense<0.000000e+00> : vector<12x1xf32>
    %53 = tpu.matmul %2, %52, %cst_24 {dimension_numbers = #tpu.dot_dimension_numbers<[1], [0], [0], [1], [0, 0, 1, 1], [], []>} : vector<12x10xbf16>, vector<10x1xbf16>, vector<12x1xf32> -> vector<12x1xf32>
    %54 = arith.truncf %27 : vector<12x9xf32> to vector<12x9xbf16>
    %cst_25 = arith.constant dense<0.000000e+00> : vector<10x9xf32>
    %55 = tpu.matmul %3, %54, %cst_25 {dimension_numbers = #tpu.dot_dimension_numbers<[1], [0], [0], [1], [0, 0, 1, 1], [], []>} : vector<10x12xbf16>, vector<12x9xbf16>, vector<10x9xf32> -> vector<10x9xf32>
    %56 = tpu.concatenate %53, %27 in 1 : vector<12x1xf32>, vector<12x9xf32> -> vector<12x10xf32>
    %c0_26 = arith.constant 0 : index
    %c0_27 = arith.constant 0 : index
    %57 = vector.load %arg12[%c0_26, %c0_27] : memref<10x16xf32, #tpu.memory_space<vmem>>, vector<10x16xf32>
    %cst_28 = arith.constant dense<0.000000e+00> : vector<12x16xf32>
    %58 = tpu.matmul %56, %57, %cst_28 {dimension_numbers = #tpu.dot_dimension_numbers<[1], [0], [0], [1], [0, 0, 1, 1], [], []>} : vector<12x10xf32>, vector<10x16xf32>, vector<12x16xf32> -> vector<12x16xf32>
    %c0_29 = arith.constant 0 : index
    %c0_30 = arith.constant 0 : index
    %59 = vector.load %arg13[%c0_29, %c0_30] : memref<1x16xf32, #tpu.memory_space<vmem>>, vector<1x16xf32>
    %60 = vector.broadcast %59 : vector<1x16xf32> to vector<12x16xf32>
    %61 = arith.addf %58, %60 : vector<12x16xf32>
    %cst_31 = arith.constant 0.000000e+00 : f32
    %62 = vector.broadcast %cst_31 : f32 to vector<12x16xf32>
    %63 = arith.maximumf %61, %62 : vector<12x16xf32>
    %64 = tpu.concatenate %55, %51 in 1 : vector<10x9xf32>, vector<10x1xf32> -> vector<10x10xf32>
    %c0_32 = arith.constant 0 : index
    %c0_33 = arith.constant 0 : index
    %65 = vector.load %arg14[%c0_32, %c0_33] : memref<10x8xf32, #tpu.memory_space<vmem>>, vector<10x8xf32>
    %cst_34 = arith.constant dense<0.000000e+00> : vector<10x8xf32>
    %66 = tpu.matmul %64, %65, %cst_34 {dimension_numbers = #tpu.dot_dimension_numbers<[1], [0], [0], [1], [0, 0, 1, 1], [], []>} : vector<10x10xf32>, vector<10x8xf32>, vector<10x8xf32> -> vector<10x8xf32>
    %c0_35 = arith.constant 0 : index
    %c0_36 = arith.constant 0 : index
    %67 = vector.load %arg15[%c0_35, %c0_36] : memref<1x8xf32, #tpu.memory_space<vmem>>, vector<1x8xf32>
    %68 = vector.broadcast %67 : vector<1x8xf32> to vector<10x8xf32>
    %69 = arith.addf %66, %68 : vector<10x8xf32>
    %cst_37 = arith.constant 0.000000e+00 : f32
    %70 = vector.broadcast %cst_37 : f32 to vector<10x8xf32>
    %71 = arith.maximumf %69, %70 : vector<10x8xf32>
    %cst_38 = arith.constant dense<0.000000e+00> : vector<16xf32>
    %72 = vector.multi_reduction <add>, %63, %cst_38 [0] : vector<12x16xf32> to vector<16xf32>
    %73 = vector.shape_cast %72 : vector<16xf32> to vector<1x16xf32>
    %cst_39 = arith.constant 1.200000e+01 : f32
    %74 = vector.broadcast %cst_39 : f32 to vector<1x16xf32>
    %75 = arith.divf %73, %74 : vector<1x16xf32>
    %76 = vector.broadcast %75 : vector<1x16xf32> to vector<12x16xf32>
    %77 = arith.subf %63, %76 : vector<12x16xf32>
    %78 = arith.mulf %77, %77 : vector<12x16xf32>
    %cst_40 = arith.constant dense<0.000000e+00> : vector<16xf32>
    %79 = vector.multi_reduction <add>, %78, %cst_40 [0] : vector<12x16xf32> to vector<16xf32>
    %80 = vector.shape_cast %79 : vector<16xf32> to vector<1x16xf32>
    %cst_41 = arith.constant 1.200000e+01 : f32
    %81 = vector.broadcast %cst_41 : f32 to vector<1x16xf32>
    %82 = arith.divf %80, %81 : vector<1x16xf32>
    %83 = vector.broadcast %75 : vector<1x16xf32> to vector<12x16xf32>
    %84 = arith.subf %63, %83 : vector<12x16xf32>
    %cst_42 = arith.constant 9.99999974E-6 : f32
    %85 = vector.broadcast %cst_42 : f32 to vector<1x16xf32>
    %86 = arith.addf %82, %85 : vector<1x16xf32>
    %87 = math.rsqrt %86 : vector<1x16xf32>
    %88 = vector.broadcast %87 : vector<1x16xf32> to vector<12x16xf32>
    %89 = arith.mulf %84, %88 : vector<12x16xf32>
    %c0_43 = arith.constant 0 : index
    %c0_44 = arith.constant 0 : index
    %90 = vector.load %arg16[%c0_43, %c0_44] : memref<1x16xf32, #tpu.memory_space<vmem>>, vector<1x16xf32>
    %91 = vector.broadcast %90 : vector<1x16xf32> to vector<12x16xf32>
    %92 = arith.mulf %89, %91 : vector<12x16xf32>
    %c0_45 = arith.constant 0 : index
    %c0_46 = arith.constant 0 : index
    %93 = vector.load %arg17[%c0_45, %c0_46] : memref<1x16xf32, #tpu.memory_space<vmem>>, vector<1x16xf32>
    %94 = vector.broadcast %93 : vector<1x16xf32> to vector<12x16xf32>
    %95 = arith.addf %92, %94 : vector<12x16xf32>
    %cst_47 = arith.constant dense<0.000000e+00> : vector<8xf32>
    %96 = vector.multi_reduction <add>, %71, %cst_47 [0] : vector<10x8xf32> to vector<8xf32>
    %97 = vector.shape_cast %96 : vector<8xf32> to vector<1x8xf32>
    %cst_48 = arith.constant 1.000000e+01 : f32
    %98 = vector.broadcast %cst_48 : f32 to vector<1x8xf32>
    %99 = arith.divf %97, %98 : vector<1x8xf32>
    %100 = vector.broadcast %99 : vector<1x8xf32> to vector<10x8xf32>
    %101 = arith.subf %71, %100 : vector<10x8xf32>
    %102 = arith.mulf %101, %101 : vector<10x8xf32>
    %cst_49 = arith.constant dense<0.000000e+00> : vector<8xf32>
    %103 = vector.multi_reduction <add>, %102, %cst_49 [0] : vector<10x8xf32> to vector<8xf32>
    %104 = vector.shape_cast %103 : vector<8xf32> to vector<1x8xf32>
    %cst_50 = arith.constant 1.000000e+01 : f32
    %105 = vector.broadcast %cst_50 : f32 to vector<1x8xf32>
    %106 = arith.divf %104, %105 : vector<1x8xf32>
    %107 = vector.broadcast %99 : vector<1x8xf32> to vector<10x8xf32>
    %108 = arith.subf %71, %107 : vector<10x8xf32>
    %cst_51 = arith.constant 9.99999974E-6 : f32
    %109 = vector.broadcast %cst_51 : f32 to vector<1x8xf32>
    %110 = arith.addf %106, %109 : vector<1x8xf32>
    %111 = math.rsqrt %110 : vector<1x8xf32>
    %112 = vector.broadcast %111 : vector<1x8xf32> to vector<10x8xf32>
    %113 = arith.mulf %108, %112 : vector<10x8xf32>
    %c0_52 = arith.constant 0 : index
    %c0_53 = arith.constant 0 : index
    %114 = vector.load %arg18[%c0_52, %c0_53] : memref<1x8xf32, #tpu.memory_space<vmem>>, vector<1x8xf32>
    %115 = vector.broadcast %114 : vector<1x8xf32> to vector<10x8xf32>
    %116 = arith.mulf %113, %115 : vector<10x8xf32>
    %c0_54 = arith.constant 0 : index
    %c0_55 = arith.constant 0 : index
    %117 = vector.load %arg19[%c0_54, %c0_55] : memref<1x8xf32, #tpu.memory_space<vmem>>, vector<1x8xf32>
    %118 = vector.broadcast %117 : vector<1x8xf32> to vector<10x8xf32>
    %119 = arith.addf %116, %118 : vector<10x8xf32>
    %120 = arith.truncf %119 : vector<10x8xf32> to vector<10x8xbf16>
    %cst_56 = arith.constant dense<0.000000e+00> : vector<12x8xf32>
    %121 = tpu.matmul %2, %120, %cst_56 {dimension_numbers = #tpu.dot_dimension_numbers<[1], [0], [0], [1], [0, 0, 1, 1], [], []>} : vector<12x10xbf16>, vector<10x8xbf16>, vector<12x8xf32> -> vector<12x8xf32>
    %122 = arith.truncf %95 : vector<12x16xf32> to vector<12x16xbf16>
    %cst_57 = arith.constant dense<0.000000e+00> : vector<10x16xf32>
    %123 = tpu.matmul %3, %122, %cst_57 {dimension_numbers = #tpu.dot_dimension_numbers<[1], [0], [0], [1], [0, 0, 1, 1], [], []>} : vector<10x12xbf16>, vector<12x16xbf16>, vector<10x16xf32> -> vector<10x16xf32>
    %124 = tpu.concatenate %121, %95 in 1 : vector<12x8xf32>, vector<12x16xf32> -> vector<12x24xf32>
    %c0_58 = arith.constant 0 : index
    %c0_59 = arith.constant 0 : index
    %125 = vector.load %arg20[%c0_58, %c0_59] : memref<24x16xf32, #tpu.memory_space<vmem>>, vector<24x16xf32>
    %cst_60 = arith.constant dense<0.000000e+00> : vector<12x16xf32>
    %126 = tpu.matmul %124, %125, %cst_60 {dimension_numbers = #tpu.dot_dimension_numbers<[1], [0], [0], [1], [0, 0, 1, 1], [], []>} : vector<12x24xf32>, vector<24x16xf32>, vector<12x16xf32> -> vector<12x16xf32>
    %c0_61 = arith.constant 0 : index
    %c0_62 = arith.constant 0 : index
    %127 = vector.load %arg21[%c0_61, %c0_62] : memref<1x16xf32, #tpu.memory_space<vmem>>, vector<1x16xf32>
    %128 = vector.broadcast %127 : vector<1x16xf32> to vector<12x16xf32>
    %129 = arith.addf %126, %128 : vector<12x16xf32>
    %cst_63 = arith.constant 0.000000e+00 : f32
    %130 = vector.broadcast %cst_63 : f32 to vector<12x16xf32>
    %131 = arith.maximumf %129, %130 : vector<12x16xf32>
    %132 = tpu.concatenate %123, %119 in 1 : vector<10x16xf32>, vector<10x8xf32> -> vector<10x24xf32>
    %c0_64 = arith.constant 0 : index
    %c0_65 = arith.constant 0 : index
    %133 = vector.load %arg22[%c0_64, %c0_65] : memref<24x8xf32, #tpu.memory_space<vmem>>, vector<24x8xf32>
    %cst_66 = arith.constant dense<0.000000e+00> : vector<10x8xf32>
    %134 = tpu.matmul %132, %133, %cst_66 {dimension_numbers = #tpu.dot_dimension_numbers<[1], [0], [0], [1], [0, 0, 1, 1], [], []>} : vector<10x24xf32>, vector<24x8xf32>, vector<10x8xf32> -> vector<10x8xf32>
    %c0_67 = arith.constant 0 : index
    %c0_68 = arith.constant 0 : index
    %135 = vector.load %arg23[%c0_67, %c0_68] : memref<1x8xf32, #tpu.memory_space<vmem>>, vector<1x8xf32>
    %136 = vector.broadcast %135 : vector<1x8xf32> to vector<10x8xf32>
    %137 = arith.addf %134, %136 : vector<10x8xf32>
    %cst_69 = arith.constant 0.000000e+00 : f32
    %138 = vector.broadcast %cst_69 : f32 to vector<10x8xf32>
    %139 = arith.maximumf %137, %138 : vector<10x8xf32>
    %cst_70 = arith.constant dense<0.000000e+00> : vector<16xf32>
    %140 = vector.multi_reduction <add>, %131, %cst_70 [0] : vector<12x16xf32> to vector<16xf32>
    %141 = vector.shape_cast %140 : vector<16xf32> to vector<1x16xf32>
    %cst_71 = arith.constant 1.200000e+01 : f32
    %142 = vector.broadcast %cst_71 : f32 to vector<1x16xf32>
    %143 = arith.divf %141, %142 : vector<1x16xf32>
    %144 = vector.broadcast %143 : vector<1x16xf32> to vector<12x16xf32>
    %145 = arith.subf %131, %144 : vector<12x16xf32>
    %146 = arith.mulf %145, %145 : vector<12x16xf32>
    %cst_72 = arith.constant dense<0.000000e+00> : vector<16xf32>
    %147 = vector.multi_reduction <add>, %146, %cst_72 [0] : vector<12x16xf32> to vector<16xf32>
    %148 = vector.shape_cast %147 : vector<16xf32> to vector<1x16xf32>
    %cst_73 = arith.constant 1.200000e+01 : f32
    %149 = vector.broadcast %cst_73 : f32 to vector<1x16xf32>
    %150 = arith.divf %148, %149 : vector<1x16xf32>
    %151 = vector.broadcast %143 : vector<1x16xf32> to vector<12x16xf32>
    %152 = arith.subf %131, %151 : vector<12x16xf32>
    %cst_74 = arith.constant 9.99999974E-6 : f32
    %153 = vector.broadcast %cst_74 : f32 to vector<1x16xf32>
    %154 = arith.addf %150, %153 : vector<1x16xf32>
    %155 = math.rsqrt %154 : vector<1x16xf32>
    %156 = vector.broadcast %155 : vector<1x16xf32> to vector<12x16xf32>
    %157 = arith.mulf %152, %156 : vector<12x16xf32>
    %c0_75 = arith.constant 0 : index
    %c0_76 = arith.constant 0 : index
    %158 = vector.load %arg24[%c0_75, %c0_76] : memref<1x16xf32, #tpu.memory_space<vmem>>, vector<1x16xf32>
    %159 = vector.broadcast %158 : vector<1x16xf32> to vector<12x16xf32>
    %160 = arith.mulf %157, %159 : vector<12x16xf32>
    %c0_77 = arith.constant 0 : index
    %c0_78 = arith.constant 0 : index
    %161 = vector.load %arg25[%c0_77, %c0_78] : memref<1x16xf32, #tpu.memory_space<vmem>>, vector<1x16xf32>
    %162 = vector.broadcast %161 : vector<1x16xf32> to vector<12x16xf32>
    %163 = arith.addf %160, %162 : vector<12x16xf32>
    %cst_79 = arith.constant dense<0.000000e+00> : vector<8xf32>
    %164 = vector.multi_reduction <add>, %139, %cst_79 [0] : vector<10x8xf32> to vector<8xf32>
    %165 = vector.shape_cast %164 : vector<8xf32> to vector<1x8xf32>
    %cst_80 = arith.constant 1.000000e+01 : f32
    %166 = vector.broadcast %cst_80 : f32 to vector<1x8xf32>
    %167 = arith.divf %165, %166 : vector<1x8xf32>
    %168 = vector.broadcast %167 : vector<1x8xf32> to vector<10x8xf32>
    %169 = arith.subf %139, %168 : vector<10x8xf32>
    %170 = arith.mulf %169, %169 : vector<10x8xf32>
    %cst_81 = arith.constant dense<0.000000e+00> : vector<8xf32>
    %171 = vector.multi_reduction <add>, %170, %cst_81 [0] : vector<10x8xf32> to vector<8xf32>
    %172 = vector.shape_cast %171 : vector<8xf32> to vector<1x8xf32>
    %cst_82 = arith.constant 1.000000e+01 : f32
    %173 = vector.broadcast %cst_82 : f32 to vector<1x8xf32>
    %174 = arith.divf %172, %173 : vector<1x8xf32>
    %175 = vector.broadcast %167 : vector<1x8xf32> to vector<10x8xf32>
    %176 = arith.subf %139, %175 : vector<10x8xf32>
    %cst_83 = arith.constant 9.99999974E-6 : f32
    %177 = vector.broadcast %cst_83 : f32 to vector<1x8xf32>
    %178 = arith.addf %174, %177 : vector<1x8xf32>
    %179 = math.rsqrt %178 : vector<1x8xf32>
    %180 = vector.broadcast %179 : vector<1x8xf32> to vector<10x8xf32>
    %181 = arith.mulf %176, %180 : vector<10x8xf32>
    %c0_84 = arith.constant 0 : index
    %c0_85 = arith.constant 0 : index
    %182 = vector.load %arg26[%c0_84, %c0_85] : memref<1x8xf32, #tpu.memory_space<vmem>>, vector<1x8xf32>
    %183 = vector.broadcast %182 : vector<1x8xf32> to vector<10x8xf32>
    %184 = arith.mulf %181, %183 : vector<10x8xf32>
    %c0_86 = arith.constant 0 : index
    %c0_87 = arith.constant 0 : index
    %185 = vector.load %arg27[%c0_86, %c0_87] : memref<1x8xf32, #tpu.memory_space<vmem>>, vector<1x8xf32>
    %186 = vector.broadcast %185 : vector<1x8xf32> to vector<10x8xf32>
    %187 = arith.addf %184, %186 : vector<10x8xf32>
    %188 = arith.truncf %187 : vector<10x8xf32> to vector<10x8xbf16>
    %cst_88 = arith.constant dense<0.000000e+00> : vector<12x8xf32>
    %189 = tpu.matmul %2, %188, %cst_88 {dimension_numbers = #tpu.dot_dimension_numbers<[1], [0], [0], [1], [0, 0, 1, 1], [], []>} : vector<12x10xbf16>, vector<10x8xbf16>, vector<12x8xf32> -> vector<12x8xf32>
    %190 = arith.truncf %163 : vector<12x16xf32> to vector<12x16xbf16>
    %cst_89 = arith.constant dense<0.000000e+00> : vector<10x16xf32>
    %191 = tpu.matmul %3, %190, %cst_89 {dimension_numbers = #tpu.dot_dimension_numbers<[1], [0], [0], [1], [0, 0, 1, 1], [], []>} : vector<10x12xbf16>, vector<12x16xbf16>, vector<10x16xf32> -> vector<10x16xf32>
    %192 = tpu.concatenate %189, %163 in 1 : vector<12x8xf32>, vector<12x16xf32> -> vector<12x24xf32>
    %c0_90 = arith.constant 0 : index
    %c0_91 = arith.constant 0 : index
    %193 = vector.load %arg28[%c0_90, %c0_91] : memref<24x16xf32, #tpu.memory_space<vmem>>, vector<24x16xf32>
    %cst_92 = arith.constant dense<0.000000e+00> : vector<12x16xf32>
    %194 = tpu.matmul %192, %193, %cst_92 {dimension_numbers = #tpu.dot_dimension_numbers<[1], [0], [0], [1], [0, 0, 1, 1], [], []>} : vector<12x24xf32>, vector<24x16xf32>, vector<12x16xf32> -> vector<12x16xf32>
    %c0_93 = arith.constant 0 : index
    %c0_94 = arith.constant 0 : index
    %195 = vector.load %arg29[%c0_93, %c0_94] : memref<1x16xf32, #tpu.memory_space<vmem>>, vector<1x16xf32>
    %196 = vector.broadcast %195 : vector<1x16xf32> to vector<12x16xf32>
    %197 = arith.addf %194, %196 : vector<12x16xf32>
    %cst_95 = arith.constant 0.000000e+00 : f32
    %198 = vector.broadcast %cst_95 : f32 to vector<12x16xf32>
    %199 = arith.maximumf %197, %198 : vector<12x16xf32>
    %200 = tpu.concatenate %191, %187 in 1 : vector<10x16xf32>, vector<10x8xf32> -> vector<10x24xf32>
    %c0_96 = arith.constant 0 : index
    %c0_97 = arith.constant 0 : index
    %201 = vector.load %arg30[%c0_96, %c0_97] : memref<24x8xf32, #tpu.memory_space<vmem>>, vector<24x8xf32>
    %cst_98 = arith.constant dense<0.000000e+00> : vector<10x8xf32>
    %202 = tpu.matmul %200, %201, %cst_98 {dimension_numbers = #tpu.dot_dimension_numbers<[1], [0], [0], [1], [0, 0, 1, 1], [], []>} : vector<10x24xf32>, vector<24x8xf32>, vector<10x8xf32> -> vector<10x8xf32>
    %c0_99 = arith.constant 0 : index
    %c0_100 = arith.constant 0 : index
    %203 = vector.load %arg31[%c0_99, %c0_100] : memref<1x8xf32, #tpu.memory_space<vmem>>, vector<1x8xf32>
    %204 = vector.broadcast %203 : vector<1x8xf32> to vector<10x8xf32>
    %205 = arith.addf %202, %204 : vector<10x8xf32>
    %cst_101 = arith.constant 0.000000e+00 : f32
    %206 = vector.broadcast %cst_101 : f32 to vector<10x8xf32>
    %207 = arith.maximumf %205, %206 : vector<10x8xf32>
    %c0_102 = arith.constant 0 : index
    %c0_103 = arith.constant 0 : index
    %208 = vector.load %arg4[%c0_102, %c0_103] : memref<12x2xf32, #tpu.memory_space<vmem>>, vector<12x2xf32>
    %c0_104 = arith.constant 0 : index
    %c0_105 = arith.constant 0 : index
    %209 = vector.load %arg6[%c0_104, %c0_105] : memref<10x2xf32, #tpu.memory_space<vmem>>, vector<10x2xf32>
    %c0_106 = arith.constant 0 : index
    %c0_107 = arith.constant 0 : index
    %210 = vector.load %arg5[%c0_106, %c0_107] : memref<2x12xf32, #tpu.memory_space<vmem>>, vector<2x12xf32>
    %c0_108 = arith.constant 0 : index
    %c0_109 = arith.constant 0 : index
    %211 = vector.load %arg7[%c0_108, %c0_109] : memref<2x10xf32, #tpu.memory_space<vmem>>, vector<2x10xf32>
    %c0_110 = arith.constant 0 : index
    %c0_111 = arith.constant 0 : index
    %212 = vector.load %arg32[%c0_110, %c0_111] : memref<16x8xf32, #tpu.memory_space<vmem>>, vector<16x8xf32>
    %cst_112 = arith.constant dense<0.000000e+00> : vector<12x8xf32>
    %213 = tpu.matmul %199, %212, %cst_112 {dimension_numbers = #tpu.dot_dimension_numbers<[1], [0], [0], [1], [0, 0, 1, 1], [], []>} : vector<12x16xf32>, vector<16x8xf32>, vector<12x8xf32> -> vector<12x8xf32>
    %c0_113 = arith.constant 0 : index
    %c0_114 = arith.constant 0 : index
    %214 = vector.load %arg33[%c0_113, %c0_114] : memref<1x8xf32, #tpu.memory_space<vmem>>, vector<1x8xf32>
    %215 = vector.broadcast %214 : vector<1x8xf32> to vector<12x8xf32>
    %216 = arith.addf %213, %215 : vector<12x8xf32>
    %cst_115 = arith.constant 0.000000e+00 : f32
    %217 = vector.broadcast %cst_115 : f32 to vector<12x8xf32>
    %218 = arith.maximumf %216, %217 : vector<12x8xf32>
    %c0_116 = arith.constant 0 : index
    %c0_117 = arith.constant 0 : index
    %219 = vector.load %arg34[%c0_116, %c0_117] : memref<8x1xf32, #tpu.memory_space<vmem>>, vector<8x1xf32>
    %cst_118 = arith.constant dense<0.000000e+00> : vector<12x1xf32>
    %220 = tpu.matmul %218, %219, %cst_118 {dimension_numbers = #tpu.dot_dimension_numbers<[1], [0], [0], [1], [0, 0, 1, 1], [], []>} : vector<12x8xf32>, vector<8x1xf32>, vector<12x1xf32> -> vector<12x1xf32>
    %c0_119 = arith.constant 0 : index
    %c0_120 = arith.constant 0 : index
    %221 = vector.load %arg35[%c0_119, %c0_120] : memref<1x1xf32, #tpu.memory_space<vmem>>, vector<1x1xf32>
    %222 = vector.broadcast %221 : vector<1x1xf32> to vector<12x1xf32>
    %223 = arith.addf %220, %222 : vector<12x1xf32>
    %c0_121 = arith.constant 0 : index
    %c0_122 = arith.constant 0 : index
    %224 = vector.load %arg36[%c0_121, %c0_122] : memref<8x4xf32, #tpu.memory_space<vmem>>, vector<8x4xf32>
    %cst_123 = arith.constant dense<0.000000e+00> : vector<10x4xf32>
    %225 = tpu.matmul %207, %224, %cst_123 {dimension_numbers = #tpu.dot_dimension_numbers<[1], [0], [0], [1], [0, 0, 1, 1], [], []>} : vector<10x8xf32>, vector<8x4xf32>, vector<10x4xf32> -> vector<10x4xf32>
    %c0_124 = arith.constant 0 : index
    %c0_125 = arith.constant 0 : index
    %226 = vector.load %arg37[%c0_124, %c0_125] : memref<1x4xf32, #tpu.memory_space<vmem>>, vector<1x4xf32>
    %227 = vector.broadcast %226 : vector<1x4xf32> to vector<10x4xf32>
    %228 = arith.addf %225, %227 : vector<10x4xf32>
    %cst_126 = arith.constant 0.000000e+00 : f32
    %229 = vector.broadcast %cst_126 : f32 to vector<10x4xf32>
    %230 = arith.maximumf %228, %229 : vector<10x4xf32>
    %c0_127 = arith.constant 0 : index
    %c0_128 = arith.constant 0 : index
    %231 = vector.load %arg38[%c0_127, %c0_128] : memref<4x1xf32, #tpu.memory_space<vmem>>, vector<4x1xf32>
    %cst_129 = arith.constant dense<0.000000e+00> : vector<10x1xf32>
    %232 = tpu.matmul %230, %231, %cst_129 {dimension_numbers = #tpu.dot_dimension_numbers<[1], [0], [0], [1], [0, 0, 1, 1], [], []>} : vector<10x4xf32>, vector<4x1xf32>, vector<10x1xf32> -> vector<10x1xf32>
    %c0_130 = arith.constant 0 : index
    %c0_131 = arith.constant 0 : index
    %233 = vector.load %arg39[%c0_130, %c0_131] : memref<1x1xf32, #tpu.memory_space<vmem>>, vector<1x1xf32>
    %234 = vector.broadcast %233 : vector<1x1xf32> to vector<10x1xf32>
    %235 = arith.addf %232, %234 : vector<10x1xf32>
    %cst_132 = arith.constant 0.000000e+00 : f32
    %236 = vector.broadcast %cst_132 : f32 to vector<12x2xf32>
    %237 = arith.cmpf ogt, %208, %236 : vector<12x2xf32>
    %cst_133 = arith.constant -1.000000e+30 : f32
    %238 = vector.shape_cast %223 : vector<12x1xf32> to vector<12x1xf32>
    %239 = vector.broadcast %238 : vector<12x1xf32> to vector<12x2xf32>
    %240 = vector.broadcast %cst_133 : f32 to vector<12x2xf32>
    %241 = arith.select %237, %239, %240 : vector<12x2xi1>, vector<12x2xf32>
    %cst_134 = arith.constant dense<0xFF800000> : vector<2xf32>
    %242 = vector.multi_reduction <maximumf>, %241, %cst_134 [0] : vector<12x2xf32> to vector<2xf32>
    %243 = vector.shape_cast %242 : vector<2xf32> to vector<1x2xf32>
    %244 = vector.broadcast %243 : vector<1x2xf32> to vector<12x2xf32>
    %245 = arith.subf %241, %244 : vector<12x2xf32>
    %246 = math.exp %245 : vector<12x2xf32>
    %247 = arith.mulf %246, %208 : vector<12x2xf32>
    %cst_135 = arith.constant dense<0.000000e+00> : vector<12xf32>
    %248 = vector.multi_reduction <add>, %247, %cst_135 [1] : vector<12x2xf32> to vector<12xf32>
    %249 = vector.shape_cast %248 : vector<12xf32> to vector<12x1xf32>
    %250 = vector.broadcast %249 : vector<12x1xf32> to vector<12x16xf32>
    %251 = arith.mulf %250, %199 : vector<12x16xf32>
    %cst_136 = arith.constant dense<0.000000e+00> : vector<2x16xf32>
    %252 = tpu.matmul %210, %251, %cst_136 {dimension_numbers = #tpu.dot_dimension_numbers<[1], [0], [0], [1], [0, 0, 1, 1], [], []>} : vector<2x12xf32>, vector<12x16xf32>, vector<2x16xf32> -> vector<2x16xf32>
    %cst_137 = arith.constant dense<0.000000e+00> : vector<2x1xf32>
    %253 = tpu.matmul %210, %249, %cst_137 {dimension_numbers = #tpu.dot_dimension_numbers<[1], [0], [0], [1], [0, 0, 1, 1], [], []>} : vector<2x12xf32>, vector<12x1xf32>, vector<2x1xf32> -> vector<2x1xf32>
    %cst_138 = arith.constant 9.99999996E-13 : f32
    %254 = vector.broadcast %cst_138 : f32 to vector<2x1xf32>
    %255 = arith.maximumf %253, %254 : vector<2x1xf32>
    %256 = tpu.reciprocal %255 {approx = true} : vector<2x1xf32> -> vector<2x1xf32>
    %257 = vector.broadcast %256 : vector<2x1xf32> to vector<2x16xf32>
    %258 = arith.mulf %252, %257 : vector<2x16xf32>
    %cst_139 = arith.constant 0.000000e+00 : f32
    %259 = vector.broadcast %cst_139 : f32 to vector<10x2xf32>
    %260 = arith.cmpf ogt, %209, %259 : vector<10x2xf32>
    %cst_140 = arith.constant -1.000000e+30 : f32
    %261 = vector.shape_cast %235 : vector<10x1xf32> to vector<10x1xf32>
    %262 = vector.broadcast %261 : vector<10x1xf32> to vector<10x2xf32>
    %263 = vector.broadcast %cst_140 : f32 to vector<10x2xf32>
    %264 = arith.select %260, %262, %263 : vector<10x2xi1>, vector<10x2xf32>
    %cst_141 = arith.constant dense<0xFF800000> : vector<2xf32>
    %265 = vector.multi_reduction <maximumf>, %264, %cst_141 [0] : vector<10x2xf32> to vector<2xf32>
    %266 = vector.shape_cast %265 : vector<2xf32> to vector<1x2xf32>
    %267 = vector.broadcast %266 : vector<1x2xf32> to vector<10x2xf32>
    %268 = arith.subf %264, %267 : vector<10x2xf32>
    %269 = math.exp %268 : vector<10x2xf32>
    %270 = arith.mulf %269, %209 : vector<10x2xf32>
    %cst_142 = arith.constant dense<0.000000e+00> : vector<10xf32>
    %271 = vector.multi_reduction <add>, %270, %cst_142 [1] : vector<10x2xf32> to vector<10xf32>
    %272 = vector.shape_cast %271 : vector<10xf32> to vector<10x1xf32>
    %273 = vector.broadcast %272 : vector<10x1xf32> to vector<10x8xf32>
    %274 = arith.mulf %273, %207 : vector<10x8xf32>
    %cst_143 = arith.constant dense<0.000000e+00> : vector<2x8xf32>
    %275 = tpu.matmul %211, %274, %cst_143 {dimension_numbers = #tpu.dot_dimension_numbers<[1], [0], [0], [1], [0, 0, 1, 1], [], []>} : vector<2x10xf32>, vector<10x8xf32>, vector<2x8xf32> -> vector<2x8xf32>
    %cst_144 = arith.constant dense<0.000000e+00> : vector<2x1xf32>
    %276 = tpu.matmul %211, %272, %cst_144 {dimension_numbers = #tpu.dot_dimension_numbers<[1], [0], [0], [1], [0, 0, 1, 1], [], []>} : vector<2x10xf32>, vector<10x1xf32>, vector<2x1xf32> -> vector<2x1xf32>
    %cst_145 = arith.constant 9.99999996E-13 : f32
    %277 = vector.broadcast %cst_145 : f32 to vector<2x1xf32>
    %278 = arith.maximumf %276, %277 : vector<2x1xf32>
    %279 = tpu.reciprocal %278 {approx = true} : vector<2x1xf32> -> vector<2x1xf32>
    %280 = vector.broadcast %279 : vector<2x1xf32> to vector<2x8xf32>
    %281 = arith.mulf %275, %280 : vector<2x8xf32>
    %cst_146 = arith.constant dense<0.000000e+00> : vector<2xf32>
    %282 = vector.multi_reduction <add>, %208, %cst_146 [0] : vector<12x2xf32> to vector<2xf32>
    %283 = vector.shape_cast %282 : vector<2xf32> to vector<1x2xf32>
    %cst_147 = arith.constant dense<0.000000e+00> : vector<2xf32>
    %284 = vector.multi_reduction <add>, %209, %cst_147 [0] : vector<10x2xf32> to vector<2xf32>
    %285 = vector.shape_cast %284 : vector<2xf32> to vector<1x2xf32>
    %286 = vector.extract_strided_slice %208 {offsets = [0, 0], sizes = [12, 1], strides = [1, 1]} : vector<12x2xf32> to vector<12x1xf32>
    %cst_148 = arith.constant 0.000000e+00 : f32
    %287 = vector.broadcast %cst_148 : f32 to vector<12x1xf32>
    %288 = arith.cmpf ogt, %286, %287 : vector<12x1xf32>
    %cst_149 = arith.constant -1.000000e+30 : f32
    %289 = vector.shape_cast %288 : vector<12x1xi1> to vector<12x1xi1>
    %290 = vector.broadcast %289 : vector<12x1xi1> to vector<12x16xi1>
    %291 = vector.broadcast %cst_149 : f32 to vector<12x16xf32>
    %292 = arith.select %290, %199, %291 : vector<12x16xi1>, vector<12x16xf32>
    %cst_150 = arith.constant dense<0xFF800000> : vector<16xf32>
    %293 = vector.multi_reduction <maximumf>, %292, %cst_150 [0] : vector<12x16xf32> to vector<16xf32>
    %294 = vector.shape_cast %293 : vector<16xf32> to vector<1x16xf32>
    %295 = vector.extract_strided_slice %283 {offsets = [0, 0], sizes = [1, 1], strides = [1, 1]} : vector<1x2xf32> to vector<1x1xf32>
    %cst_151 = arith.constant 0.000000e+00 : f32
    %296 = vector.broadcast %cst_151 : f32 to vector<1x1xf32>
    %297 = arith.cmpf ogt, %295, %296 : vector<1x1xf32>
    %cst_152 = arith.constant 0.000000e+00 : f32
    %298 = vector.shape_cast %297 : vector<1x1xi1> to vector<1x1xi1>
    %299 = vector.broadcast %298 : vector<1x1xi1> to vector<1x16xi1>
    %300 = vector.broadcast %cst_152 : f32 to vector<1x16xf32>
    %301 = arith.select %299, %294, %300 : vector<1x16xi1>, vector<1x16xf32>
    %302 = vector.extract_strided_slice %209 {offsets = [0, 0], sizes = [10, 1], strides = [1, 1]} : vector<10x2xf32> to vector<10x1xf32>
    %cst_153 = arith.constant 0.000000e+00 : f32
    %303 = vector.broadcast %cst_153 : f32 to vector<10x1xf32>
    %304 = arith.cmpf ogt, %302, %303 : vector<10x1xf32>
    %cst_154 = arith.constant -1.000000e+30 : f32
    %305 = vector.shape_cast %304 : vector<10x1xi1> to vector<10x1xi1>
    %306 = vector.broadcast %305 : vector<10x1xi1> to vector<10x8xi1>
    %307 = vector.broadcast %cst_154 : f32 to vector<10x8xf32>
    %308 = arith.select %306, %207, %307 : vector<10x8xi1>, vector<10x8xf32>
    %cst_155 = arith.constant dense<0xFF800000> : vector<8xf32>
    %309 = vector.multi_reduction <maximumf>, %308, %cst_155 [0] : vector<10x8xf32> to vector<8xf32>
    %310 = vector.shape_cast %309 : vector<8xf32> to vector<1x8xf32>
    %311 = vector.extract_strided_slice %285 {offsets = [0, 0], sizes = [1, 1], strides = [1, 1]} : vector<1x2xf32> to vector<1x1xf32>
    %cst_156 = arith.constant 0.000000e+00 : f32
    %312 = vector.broadcast %cst_156 : f32 to vector<1x1xf32>
    %313 = arith.cmpf ogt, %311, %312 : vector<1x1xf32>
    %cst_157 = arith.constant 0.000000e+00 : f32
    %314 = vector.shape_cast %313 : vector<1x1xi1> to vector<1x1xi1>
    %315 = vector.broadcast %314 : vector<1x1xi1> to vector<1x8xi1>
    %316 = vector.broadcast %cst_157 : f32 to vector<1x8xf32>
    %317 = arith.select %315, %310, %316 : vector<1x8xi1>, vector<1x8xf32>
    %318 = vector.extract_strided_slice %208 {offsets = [0, 1], sizes = [12, 1], strides = [1, 1]} : vector<12x2xf32> to vector<12x1xf32>
    %cst_158 = arith.constant 0.000000e+00 : f32
    %319 = vector.broadcast %cst_158 : f32 to vector<12x1xf32>
    %320 = arith.cmpf ogt, %318, %319 : vector<12x1xf32>
    %cst_159 = arith.constant -1.000000e+30 : f32
    %321 = vector.shape_cast %320 : vector<12x1xi1> to vector<12x1xi1>
    %322 = vector.broadcast %321 : vector<12x1xi1> to vector<12x16xi1>
    %323 = vector.broadcast %cst_159 : f32 to vector<12x16xf32>
    %324 = arith.select %322, %199, %323 : vector<12x16xi1>, vector<12x16xf32>
    %cst_160 = arith.constant dense<0xFF800000> : vector<16xf32>
    %325 = vector.multi_reduction <maximumf>, %324, %cst_160 [0] : vector<12x16xf32> to vector<16xf32>
    %326 = vector.shape_cast %325 : vector<16xf32> to vector<1x16xf32>
    %327 = vector.extract_strided_slice %283 {offsets = [0, 1], sizes = [1, 1], strides = [1, 1]} : vector<1x2xf32> to vector<1x1xf32>
    %cst_161 = arith.constant 0.000000e+00 : f32
    %328 = vector.broadcast %cst_161 : f32 to vector<1x1xf32>
    %329 = arith.cmpf ogt, %327, %328 : vector<1x1xf32>
    %cst_162 = arith.constant 0.000000e+00 : f32
    %330 = vector.shape_cast %329 : vector<1x1xi1> to vector<1x1xi1>
    %331 = vector.broadcast %330 : vector<1x1xi1> to vector<1x16xi1>
    %332 = vector.broadcast %cst_162 : f32 to vector<1x16xf32>
    %333 = arith.select %331, %326, %332 : vector<1x16xi1>, vector<1x16xf32>
    %334 = vector.extract_strided_slice %209 {offsets = [0, 1], sizes = [10, 1], strides = [1, 1]} : vector<10x2xf32> to vector<10x1xf32>
    %cst_163 = arith.constant 0.000000e+00 : f32
    %335 = vector.broadcast %cst_163 : f32 to vector<10x1xf32>
    %336 = arith.cmpf ogt, %334, %335 : vector<10x1xf32>
    %cst_164 = arith.constant -1.000000e+30 : f32
    %337 = vector.shape_cast %336 : vector<10x1xi1> to vector<10x1xi1>
    %338 = vector.broadcast %337 : vector<10x1xi1> to vector<10x8xi1>
    %339 = vector.broadcast %cst_164 : f32 to vector<10x8xf32>
    %340 = arith.select %338, %207, %339 : vector<10x8xi1>, vector<10x8xf32>
    %cst_165 = arith.constant dense<0xFF800000> : vector<8xf32>
    %341 = vector.multi_reduction <maximumf>, %340, %cst_165 [0] : vector<10x8xf32> to vector<8xf32>
    %342 = vector.shape_cast %341 : vector<8xf32> to vector<1x8xf32>
    %343 = vector.extract_strided_slice %285 {offsets = [0, 1], sizes = [1, 1], strides = [1, 1]} : vector<1x2xf32> to vector<1x1xf32>
    %cst_166 = arith.constant 0.000000e+00 : f32
    %344 = vector.broadcast %cst_166 : f32 to vector<1x1xf32>
    %345 = arith.cmpf ogt, %343, %344 : vector<1x1xf32>
    %cst_167 = arith.constant 0.000000e+00 : f32
    %346 = vector.shape_cast %345 : vector<1x1xi1> to vector<1x1xi1>
    %347 = vector.broadcast %346 : vector<1x1xi1> to vector<1x8xi1>
    %348 = vector.broadcast %cst_167 : f32 to vector<1x8xf32>
    %349 = arith.select %347, %342, %348 : vector<1x8xi1>, vector<1x8xf32>
    %350 = tpu.concatenate %301, %333 in 0 : vector<1x16xf32>, vector<1x16xf32> -> vector<2x16xf32>
    %351 = tpu.concatenate %317, %349 in 0 : vector<1x8xf32>, vector<1x8xf32> -> vector<2x8xf32>
    %352 = tpu.concatenate %350, %351, %258, %281 in 1 : vector<2x16xf32>, vector<2x8xf32>, vector<2x16xf32>, vector<2x8xf32> -> vector<2x48xf32>
    %c0_168 = arith.constant 0 : index
    %c0_169 = arith.constant 0 : index
    %353 = vector.load %arg40[%c0_168, %c0_169] : memref<2x48xf32, #tpu.memory_space<vmem>>, vector<2x48xf32>
    tpu.vector_store %arg40[%c0_168, %c0_169], %352 {strides = array<i32>} : memref<2x48xf32, #tpu.memory_space<vmem>>, vector<2x48xf32>,
    return
  }
}

</mosaic_0001>

<bundles_post_ra>
// kernel: tpu_custom_call.1
= control target key start
LH: loop header
LB: loop body
LE: loop exit
PB: predicated region body
PF: predicated region fallthrough
CT: control target
= control target key end

     0   :  { %s2773_s6 = smov 1   ;;  %s2774_s10 = smov 2   ;;  %s3321_s0 = inlined_call_operand.smem [shape: u32[41], index: -1, kind: input, shape index: {}] }
   0x1   :  { %s2834_s5 = sld [smem:[%s3321_s0]]   ;;  %s2775_s14 = smov 3  }
   0x2   :  { %s2839_s9 = sld [smem:[%s3321_s0 + %s2773_s6]]   ;;  %s2776_s18 = smov 4  }
   0x3   :  { %s2844_s13 = sld [smem:[%s3321_s0 + %s2774_s10]]   ;;  %s2777_s22 = smov 5  }
   0x4   :  { %s2849_s17 = sld [smem:[%s3321_s0 + %s2775_s14]]   ;;  %s2778_s26 = smov 6  }
   0x5   :  { %s2854_s21 = sld [smem:[%s3321_s0 + %s2776_s18]]   ;;  %s2779_s30 = smov 7  }
   0x6   :  { %s2859_s25 = sld [smem:[%s3321_s0 + %s2777_s22]]   ;;  %s2780_s4 = smov 8  }
   0x7   :  { %s2864_s29 = sld [smem:[%s3321_s0 + %s2778_s26]]   ;;  %s2781_s10 = smov 9  }
   0x8   :  { %s2869_s3 = sld [smem:[%s3321_s0 + %s2779_s30]]   ;;  %s2782_s15 = smov 10  }
   0x9   :  { %s2874_s8 = sld [smem:[%s3321_s0 + %s2780_s4]]   ;;  %s2783_s20 = smov 12  }
   0xa   :  { %s2879_s14 = sld [smem:[%s3321_s0 + %s2781_s10]]   ;;  %s2784_s26 = smov 13  }
   0xb   :  { %3331 = sst [smem:[#allocation9_spill]] %s2854_s21  ;;  %s2785_s1 = smov 14  }
   0xc   :  { %3332 = sst [smem:[#allocation10_spill]] %s2859_s25  ;;  %s2786_s7 = smov 15  }
   0xd   :  { %3333 = sst [smem:[#allocation11_spill]] %s2864_s29  ;;  %s2788_s22 = smov 17  }
   0xe   :  { %3334 = sst [smem:[#allocation12_spill]] %s2869_s3  ;;  %s2789_s28 = smov 18  }
   0xf   :  { %s2317_s19 = sld [smem:[%s3321_s0 + %s2782_s15]]   ;;  %s2787_s15 = smov 16  }
  0x10   :  { %s2887_s24 = sld [smem:[%s3321_s0 + %s2783_s20]]   ;;  %s2791_s16 = smov 20  }
  0x11   :  { %s2892_s30 = sld [smem:[%s3321_s0 + %s2784_s26]]   ;;  %s2795_s3 = smov 24  }
  0x12   :  { %s2897_s6 = sld [smem:[%s3321_s0 + %s2785_s1]]   ;;  %s2797_s25 = smov 26  }
  0x13   :  { %s2902_s12 = sld [smem:[%s3321_s0 + %s2786_s7]]   ;;  %s2790_s7 = smov 19  }
  0x14   :  { %s2907_s20 = sld [smem:[%s3321_s0 + %s2787_s15]]  }
  0x15   :  { %s2912_s27 = sld [smem:[%s3321_s0 + %s2788_s22]]   ;;  %v86_v0 = vstv %s2317_s19  ;;  %s2792_s19 = smov 21  }
  0x16   :  { %s2917_s4 = sld [smem:[%s3321_s0 + %s2789_s28]]   ;;  %87 = vst [vmem:[#allocation2] sm:$0x1] %v86_v0  ;;  %s2793_s28 = smov 22  }
  0x17   :  { %s2922_s15 = sld [smem:[%s3321_s0 + %s2790_s7]]   ;;  %s2794_s7 = smov 23  }
  0x18   :  { %s2927_s22 = sld [smem:[%s3321_s0 + %s2791_s16]]   ;;  %s2811_s16 = smov 35  }
  0x19   :  { %s2932_s1 = sld [smem:[%s3321_s0 + %s2792_s19]]   ;;  %s2796_s19 = smov 25  }
  0x1a   :  { %s2937_s29 = sld [smem:[%s3321_s0 + %s2793_s28]]  }
  0x1b   :  { %s2942_s21 = sld [smem:[%s3321_s0 + %s2794_s7]]   ;;  %s2798_s7 = smov 27  }
  0x1d   :  { %3335 = sst [smem:[#allocation13_spill]] %s2922_s15  ;;  %s2812_s15 = smov 39  }
  0x1e   :  { %3336 = sst [smem:[#allocation14_spill]] %s2927_s22 }
  0x1f   :  { %3337 = sst [smem:[#allocation15_spill]] %s2932_s1 }
  0x20   :  { %3338 = sst [smem:[#allocation16_spill]] %s2937_s29 }
  0x21   :  { %3339 = sst [smem:[#allocation17_spill]] %s2942_s21 }
  0x22   :  { %s2947_s22 = sld [smem:[%s3321_s0 + %s2795_s3]]   ;;  %s2799_s3 = smov 28  }
  0x23   :  { %s2952_s1 = sld [smem:[%s3321_s0 + %s2796_s19]]   ;;  %s2800_s19 = smov 29  }
  0x24   :  { %s2957_s29 = sld [smem:[%s3321_s0 + %s2797_s25]]   ;;  %s2801_s25 = smov 30  }
  0x25   :  { %s2962_s21 = sld [smem:[%s3321_s0 + %s2798_s7]]   ;;  %s2802_s7 = smov 31  }
  0x26   :  { %s2346_s26 = sld [smem:[%s3321_s0 + %s2812_s15]]  }
  0x28   :  { %3340 = sst [smem:[#allocation18_spill]] %s2947_s22 }
  0x29   :  { %3341 = sst [smem:[#allocation19_spill]] %s2952_s1 }
  0x2a   :  { %3342 = sst [smem:[#allocation20_spill]] %s2957_s29 }
  0x2b   :  { %3343 = sst [smem:[#allocation21_spill]] %s2962_s21 }
  0x2c   :  { %s2967_s22 = sld [smem:[%s3321_s0 + %s2799_s3]]   ;;  %s2803_s3 = smov 32   ;;  %v92_v3 = vstv %s2346_s26 }
  0x2d   :  { %s2972_s1 = sld [smem:[%s3321_s0 + %s2800_s19]]   ;;  %s2804_s19 = smov 33   ;;  %93 = vst [vmem:[#allocation5] sm:$0x1] %v92_v3 }
  0x2e   :  { %s2977_s29 = sld [smem:[%s3321_s0 + %s2801_s25]]   ;;  %s2805_s25 = smov 34  }
  0x2f   :  { %s2982_s21 = sld [smem:[%s3321_s0 + %s2802_s7]]   ;;  %s2806_s7 = smov 36  }
  0x32   :  { %3344 = sst [smem:[#allocation22_spill]] %s2967_s22 }
  0x33   :  { %3345 = sst [smem:[#allocation23_spill]] %s2972_s1 }
  0x34   :  { %3346 = sst [smem:[#allocation24_spill]] %s2977_s29 }
  0x35   :  { %3347 = sst [smem:[#allocation25_spill]] %s2982_s21 }
  0x36   :  { %s2987_s22 = sld [smem:[%s3321_s0 + %s2803_s3]]   ;;  %s2807_s3 = smov 37  }
  0x37   :  { %s2992_s1 = sld [smem:[%s3321_s0 + %s2804_s19]]   ;;  %s2808_s19 = smov 38  }
  0x38   :  { %s2997_s29 = sld [smem:[%s3321_s0 + %s2805_s25]]   ;;  %s2809_s25 = smov 40  }
  0x39   :  { %s3002_s21 = sld [smem:[%s3321_s0 + %s2806_s7]]   ;;  %s2810_s7 = smov 11  }
  0x3c   :  { %3348 = sst [smem:[#allocation26_spill]] %s2987_s22 }
  0x3d   :  { %3349 = sst [smem:[#allocation27_spill]] %s2992_s1 }
  0x3e   :  { %3350 = sst [smem:[#allocation28_spill]] %s2997_s29 }
  0x3f   :  { %3351 = sst [smem:[#allocation29_spill]] %s3002_s21 }
  0x40   :  { %s3007_s22 = sld [smem:[%s3321_s0 + %s2807_s3]]  }
  0x41   :  { %s3012_s1 = sld [smem:[%s3321_s0 + %s2808_s19]]  }
  0x42   :  { %s3017_s29 = sld [smem:[%s3321_s0 + %s2809_s25]]  }
  0x43   :  { %s2318_s21 = sld [smem:[%s3321_s0 + %s2810_s7]]  }
  0x46   :  { %3352 = sst [smem:[#allocation30_spill]] %s3007_s22 }
  0x47   :  { %s2342_s22 = sld [smem:[%s3321_s0 + %s2811_s16]]  }
  0x49   :  { %v88_v1 = vstv %s2318_s21 }
  0x4a   :  { %89 = vst [vmem:[#allocation3] sm:$0x1] %v88_v1 }
  0x4d   :  { %v90_v2 = vstv %s2342_s22 }
  0x4e   :  { %91 = vst [vmem:[#allocation4] sm:$0x1] %v90_v2 }
  0x4f   :  { %v178_v4 = vld [vmem:[%s2839_s9] sm:$0xff]  ;;  %v179_v5 = vld [vmem:[%s2839_s9 + $0x8] sm:$0x3]  ;;  %vm233_vm0 = vcmask 7168   ;;  %vm235_vm1 = vcmask 1024   ;;  %v2813_v6 = vmov 0.0  }
  0x50   :  { %2474 = vmatprep.subr.bf16.mxu0 %v2813_v6  ;;  %2480 = vmatprep.subr.bf16.mxu1 %v2813_v6  ;;  %v234_v7 = vsel %vm233_vm0, %v178_v4, 0.0  ;;  %v236_v8 = vsel %vm235_vm1, %v179_v5, 0.0  ;;  %v176_v10 = vld [vmem:[%s2834_s5] sm:$0xff]  ;;  %v177_v11 = vld [vmem:[%s2834_s5 + $0x8] sm:$0xf]  ;;  %vm184_vm2 = vcmask 72704  }
  0x51   :  { %v237_v9 = vadd.f32 %v236_v8, %v234_v7  ;;  %vm186_vm3 = vcmask 68608   ;;  %v185_v12 = vsel %vm184_vm2, %v176_v10, 0.0  ;;  %vm2814_vm4 = vmmov 0  }
  0x52   :  { %v187_v13 = vsel %vm186_vm3, %v177_v11, 0.0  ;;  %2476 = vmatprep.mubr.msk.bf16.mxu0 %vm2814_vm4, %v2813_v6  ;;  %2482 = vmatprep.mubr.msk.bf16.mxu1 %vm2814_vm4, %v2813_v6 }
  0x53   :  { %v238_v14 = vrot.slane %v237_v9, 4  ;;  %v188_v15 = vadd.f32 %v187_v13, %v185_v12 }
  0x55   :  { %v239_v16 = vadd.f32 %v238_v14, %v237_v9  ;;  %v189_v17 = vrot.slane %v188_v15, 4 }
  0x57   :  { %v240_v18 = vrot.slane %v239_v16, 2  ;;  %v190_v19 = vadd.f32 %v189_v17, %v188_v15 }
  0x58   :  { %94 = vsyncpa [#allocation7], 0  ;;  %v2350_v60 = vld [vmem:[#allocation2] ss:$0 sm:$0xff]  ;;  %v2351_v0 = vld [vmem:[#allocation3] ss:$0 sm:$0xff] }
  0x59   :  { %v241_v20 = vadd.f32 %v240_v18, %v239_v16  ;;  %v191_v21 = vrot.slane %v190_v19, 2  ;;  %v2348_v1 = vld [vmem:[%s2874_s8] ss:$0 sm:$0xff]  ;;  %v403_v9 = vld [vmem:[%s2887_s24 + $0x8] sm:$0x3]  ;;  %vm417_vm5 = vcmask 1041408  }
  0x5a   :  { %v2349_v7 = vld [vmem:[%s2879_s14] ss:$0 sm:$0xff]  ;;  %vm292_vm6 = vcmask 1044480   ;;  %s2815_s0 = smov 9   ;;  %vm347_vm7 = vcmask 1045504   ;;  %vm2816_vm8 = vmmov 1  }
  0x5b   :  { %v242_v22 = vrot.slane %v241_v20, 1  ;;  %v192_v23 = vadd.f32 %v191_v21, %v190_v19  ;;  %v402_v8 = vld [vmem:[%s2887_s24] sm:$0xff]  ;;  %vm3051_vm9 = vmpackc.low %vm417_vm5, %vm2816_vm8  ;;  %s2817_s5 = smov 1   ;;  %vm288_vm10 = vcmask 80896   ;;  %vm343_vm11 = vcmask 97280   ;;  %s3355_s9 = sld [smem:[#allocation13_spill]] }
  0x5c   :  { %v2610_v17 = vpack.c.bf16 %v403_v9, %v402_v8  ;;  %v3057_v21 = vld [vmem:[%s2844_s13] sm:$0x3f]   ;;  %vm3330_vm12 = vcmask 125952   ;;  %vm603_vm13 = vcmask 130048   ;;  %vm653_vm14 = vcmask 58368   ;;  %s3356_s13 = sld [smem:[#allocation16_spill]] }
  0x5d   :  { %v243_v24 = vadd.f32 %v242_v22, %v241_v20  ;;  %v193_v25 = vrot.slane %v192_v23, 1  ;;  %vm651_vm15 = vcmask 64512   ;;  %s2818_s21 = smov 16   ;;  %s2819_s8 = smov 8   ;;  %vm1772_vm5 = vcmask 11264  }
  0x5e   :  { %s3358_s14 = sld [smem:[#allocation17_spill]]  ;;  %s3359_s24 = sld [smem:[#allocation15_spill]] }
  0x5f   :  { %v245_v26 = vmul.f32 0.1, %v243_v24  ;;  %v194_v27 = vadd.f32 %v193_v25, %v192_v23  ;;  %v3061_v23 = vld [vmem:[%s2849_s17] sm:$0x1f]   ;;  %v509_v25 = vld [vmem:[%s2897_s6 + $0x8] sm:$0x3] }
  0x60   :  { %v508_v24 = vld [vmem:[%s2897_s6] sm:$0xff]  ;;  %s3357_s17 = sld [smem:[#allocation14_spill]]  ;;  %s3361_s6 = sld [smem:[#allocation18_spill]] }
  0x61   :  { %v246_v28 = vsub.f32 %v178_v4, %v245_v26  ;;  %v247_v29 = vsub.f32 %v179_v5, %v245_v26  ;;  %v196_v30 = vmul.f32 0.083333336, %v194_v27  ;;  %v2616_v26 = vpack.c.bf16 %v509_v25, %v508_v24  ;;  %s3366_s15 = sld [smem:[#allocation26_spill]]  ;;  %s3367_s22 = sld [smem:[#allocation29_spill]] }
  0x62   :  { %s3368_s25 = sld [smem:[#allocation23_spill]]  ;;  %s3369_s28 = sld [smem:[#allocation25_spill]] }
  0x63   :  { %v248_v31 = vmul.f32 %v246_v28, %v246_v28  ;;  %v249_v32 = vmul.f32 %v247_v29, %v247_v29  ;;  %v197_v33 = vsub.f32 %v176_v10, %v196_v30  ;;  %v198_v34 = vsub.f32 %v177_v11, %v196_v30  ;;  %s3370_s2 = sld [smem:[#allocation28_spill]]  ;;  %s3371_s7 = sld [smem:[#allocation27_spill]] }
  0x64   :  { %s3372_s10 = sld [smem:[#allocation30_spill]]  ;;  %s3374_s11 = sld [smem:[#allocation11_spill]] }
  0x65   :  { %v250_v35 = vsel %vm233_vm0, %v248_v31, 0.0  ;;  %v251_v36 = vsel %vm235_vm1, %v249_v32, 0.0  ;;  %v199_v37 = vmul.f32 %v197_v33, %v197_v33  ;;  %v200_v38 = vmul.f32 %v198_v34, %v198_v34  ;;  %s3375_s16 = sld [smem:[#allocation10_spill]]  ;;  %s3376_s3 = sld [smem:[#allocation12_spill]] }
  0x66   :  { %v252_v39 = vadd.f32 %v251_v36, %v250_v35  ;;  %vm1677_vm1 = vcmask 1043456   ;;  %s2823_s18 = smov 24   ;;  %s2824_s23 = smov 40  }
  0x67   :  { %v201_v40 = vsel %vm184_vm2, %v199_v37, 0.0  ;;  %v202_v41 = vsel %vm186_vm3, %v200_v38, 0.0  ;;  %s2825_s19 = smov [#allocation6]  }
  0x68   :  { %v253_v42 = vrot.slane %v252_v39, 4  ;;  %v203_v43 = vadd.f32 %v202_v41, %v201_v40  ;;  %s2300_s26 = sshll.u32 %s2825_s19, 4  ;;  %s2301_s26 = int_to_ptr.vmem [resolvable:$true] %s2300_s26 }
  0x69   :  { %p2754_p1 = scmp.lt.s32.totalorder %s2301_s26, %s2301_s26 }
  0x6a   :  { %v254_v44 = vadd.f32 %v253_v42, %v252_v39  ;;  %v204_v45 = vrot.slane %v203_v43, 4 }
  0x6c   :  { %v255_v46 = vrot.slane %v254_v44, 2  ;;  %v205_v47 = vadd.f32 %v204_v45, %v203_v43  ;;  %v2356_v43 = vld [vmem:[%s2892_s30] ss:$0 sm:$0xff]  ;;  %s3360_s30 = sld [smem:[#allocation20_spill]] }
  0x6d   :  { %v2360_v45 = vld [vmem:[%s2902_s12] ss:$0 sm:$0xff]  ;;  %s3362_s12 = sld [smem:[#allocation21_spill]] }
  0x6e   :  { %v256_v48 = vadd.f32 %v255_v46, %v254_v44  ;;  %v206_v49 = vrot.slane %v205_v47, 2 }
  0x70   :  { %v257_v50 = vrot.slane %v256_v48, 1  ;;  %v207_v51 = vadd.f32 %v206_v49, %v205_v47 }
  0x72   :  { %v258_v52 = vadd.f32 %v257_v50, %v256_v48  ;;  %v208_v53 = vrot.slane %v207_v51, 1 }
  0x74   :  { %v259_v54 = vmul.f32 0.1, %v258_v52  ;;  %v209_v55 = vadd.f32 %v208_v53, %v207_v51 }
  0x76   :  { %v260_v56 = vadd.f32 1e-05, %v259_v54  ;;  %v210_v57 = vmul.f32 0.083333336, %v209_v55 }
  0x78   :  { %2725 = vrsqrt.f32 %v260_v56  ;;  %v211_v58 = vadd.f32 1e-05, %v210_v57 }
  0x7a   :  { %2727 = vrsqrt.f32 %v211_v58 }
  0x82   :  { %v2726_v59 = vpop.eup %2725 }
  0x83   :  { %v262_v61 = vmul.f32 %v2726_v59, %v246_v28  ;;  %v263_v62 = vmul.f32 %v2726_v59, %v247_v29 }
  0x84   :  { %v2728_v63 = vpop.eup %2727 }
  0x85   :  { %v271_v2 = vmul.f32 %v2350_v60, %v262_v61  ;;  %v272_v3 = vmul.f32 %v2350_v60, %v263_v62  ;;  %v213_v4 = vmul.f32 %v2728_v63, %v197_v33  ;;  %v214_v5 = vmul.f32 %v2728_v63, %v198_v34 }
  0x87   :  { %v280_v10 = vadd.f32 %v2351_v0, %v271_v2  ;;  %v281_v11 = vadd.f32 %v2351_v0, %v272_v3  ;;  %v222_v12 = vmul.f32 %v2348_v1, %v213_v4  ;;  %v223_v13 = vmul.f32 %v2348_v1, %v214_v5 }
  0x89   :  { %v282_v14 = vpack.c.bf16 %v281_v11, %v280_v10  ;;  %v231_v15 = vadd.f32 %v2349_v7, %v222_v12  ;;  %v232_v16 = vadd.f32 %v2349_v7, %v223_v13  ;;  %500 = vrot.lane.b32.xlu1 %v280_v10, %s2815_s0 }
  0x8b   :  { %v294_v19 = vsel %vm292_vm6, %v282_v14, 0  ;;  %v337_v20 = vpack.c.bf16 %v232_v16, %v231_v15  ;;  %394 = vrot.lane.b32.xlu0 %v231_v15, %s2817_s5 }
  0x8c   :  { %2475 = vmatpush3.bf16.msra.mxu0 %v294_v19 }
  0x8d   :  { %v349_v22 = vsel %vm347_vm7, %v337_v20, 0  ;;  %502 = vrot.lane.b32.xlu1 %v281_v11, %s2815_s0  ;;  %2612 = vmatprep.subr.msk.bf16.mxu0 %vm3051_vm9, %v2610_v17  ;;  %s2749_s0 = scalar_lea.vmem %s2301_s26, 32 }
  0x8e   :  { %2481 = vmatpush3.bf16.msra.mxu1 %v349_v22  ;;  %p2750_p0 = scmp.ne.s32.totalorder %s2301_s26, %s2749_s0  ;;  %p2755_p2 = scmp.lt.s32.totalorder %s2749_s0, %s2749_s0 }
  0x8f   :  { %2477 = vmatmul.mubr.msk.bf16.vlgmr.msra.gmra.mrb[0].mxu0 %vm288_vm10, %v3057_v21  ;;  %396 = vrot.lane.b32.xlu0 %v232_v16, %s2817_s5 }
  0x90   :  { %2615 = vmatpush3.bf16.msk.msra.mxu0 %vm3051_vm9, %v2610_v17  ;;  %2618 = vmatprep.subr.msk.bf16.mxu1 %vm3051_vm9, %v2616_v26  ;;  %p2756_p3 = por %p2755_p2, %p2754_p1 }
  0x91   :  { %2483 = vmatmul.mubr.msk.bf16.vlgmr.msra.gmra.mrb[0].mxu1 %vm343_vm11, %v3061_v23  ;;  %2500 = vmatprep.subr.bf16.mxu0 %v2813_v6 }
  0x92   :  { %2621 = vmatpush3.bf16.msk.msra.mxu1 %vm3051_vm9, %v2616_v26  ;;  %p2757_p4 = pnand %p2756_p3, %p2750_p0 }
  0x93   :  { %2506 = vmatprep.subr.bf16.mxu1 %v2813_v6 }
  0xfb   :  { %v501_v28 = vpop.permute.xlu1 %500 }
  0xfd   :  { %v395_v27 = vpop.permute.xlu0 %394 }
  0xff   :  { %v503_v33 = vpop.permute.xlu1 %502 }
 0x101   :  { %v397_v30 = vpop.permute.xlu0 %396 }
 0x162   :  { %v330_v29 = vpop.f32.mrb[0].mxu0 }
 0x163   :  { %v400_v31 = vsel %vm233_vm0, %v330_v29, %v395_v27  ;;  %v2478_v32 = vpop.f32.mrb[1].mxu0 }
 0x164   :  { %v385_v34 = vpop.f32.mrb[0].mxu1  ;;  %v333_v35 = vpop.f32.mrb[2].mxu0  ;;  %2490 = vmatprep.mubr.msk.f32.mxu0 %vm288_vm10, %v400_v31 }
 0x165   :  { %v506_v36 = vsel %vm184_vm2, %v385_v34, %v501_v28  ;;  %v2484_v37 = vpop.f32.mrb[1].mxu1  ;;  %v401_v38 = vsel %vm233_vm0, %v333_v35, %v397_v30  ;;  %v2479_v39 = vpop.f32.mrb[3].mxu0  ;;  %vm3329_vm0 = vcmask 195584  }
 0x166   :  { %v388_v40 = vpop.f32.mrb[2].mxu1  ;;  %2497 = vmatprep.mubr.msk.f32.mxu1 %vm288_vm10, %v506_v36  ;;  %2491 = vmatmul.mubr.msk.f32.vlgmr.msra.gmra.mrb[4].mxu0 %vm288_vm10, %v401_v38 }
 0x167   :  { %v507_v41 = vsel %vm184_vm2, %v388_v40, %v503_v33  ;;  %v2485_v42 = vpop.f32.mrb[3].mxu1  ;;  %2502 = vmatprep.mubr.msk.bf16.mxu0 %vm2814_vm4, %v2813_v6  ;;  %vm1670_vm2 = vcmask 31744  }
 0x168   :  { %2498 = vmatmul.mubr.msk.f32.vlgmr.msra.gmra.mrb[4].mxu1 %vm288_vm10, %v507_v41 }
 0x169   :  { %2508 = vmatprep.mubr.msk.bf16.mxu1 %vm2814_vm4, %v2813_v6 }
 0x239   :  { %v2492_v44 = vpop.f32.mrb[4].mxu0 }
 0x23a   :  { %v493_v46 = vadd.f32 %v2492_v44, %v2356_v43  ;;  %v487_v47 = vpop.f32.mrb[5].mxu0 }
 0x23b   :  { %v2499_v48 = vpop.f32.mrb[4].mxu1  ;;  %v488_v49 = vadd.f32 %v2356_v43, %v487_v47 }
 0x23c   :  { %v497_v50 = vmax.f32 %v493_v46, 0.0  ;;  %v598_v51 = vadd.f32 %v2499_v48, %v2360_v45  ;;  %v592_v52 = vpop.f32.mrb[5].mxu1  ;;  %v2364_v48 = vld [vmem:[%s2907_s20] ss:$0 sm:$0xff]  ;;  %s3363_s20 = sld [smem:[#allocation19_spill]] }
 0x23d   :  { %v496_v53 = vmax.f32 %v488_v49, 0.0  ;;  %v593_v54 = vadd.f32 %v2360_v45, %v592_v52  ;;  %v2366_v52 = vld [vmem:[%s2917_s4] ss:$0 sm:$0xff]  ;;  %s3365_s4 = sld [smem:[#allocation24_spill]] }
 0x23e   :  { %v606_v55 = vsel %vm3330_vm12, %v497_v50, 0.0  ;;  %v602_v56 = vmax.f32 %v598_v51, 0.0 }
 0x23f   :  { %v604_v57 = vsel %vm603_vm13, %v496_v53, 0.0  ;;  %v601_v58 = vmax.f32 %v593_v54, 0.0 }
 0x240   :  { %v654_v59 = vsel %vm653_vm14, %v602_v56, 0.0  ;;  %v607_v60 = vadd.f32 %v606_v55, %v604_v57 }
 0x241   :  { %v652_v61 = vsel %vm651_vm15, %v601_v58, 0.0 }
 0x242   :  { %v608_v62 = vrot.slane %v607_v60, 4  ;;  %v655_v63 = vadd.f32 %v654_v59, %v652_v61  ;;  %v903_v59 = vld [vmem:[%s3356_s13] sm:$0xff] }
 0x244   :  { %v609_v0 = vadd.f32 %v608_v62, %v607_v60  ;;  %v656_v1 = vrot.slane %v655_v63, 4  ;;  %v904_v60 = vld [vmem:[%s3356_s13 + $0x8] sm:$0xff] }
 0x246   :  { %v610_v2 = vrot.slane %v609_v0, 2  ;;  %v657_v3 = vadd.f32 %v656_v1, %v655_v63 }
 0x248   :  { %v611_v4 = vadd.f32 %v610_v2, %v609_v0  ;;  %v658_v5 = vrot.slane %v657_v3, 2 }
 0x24a   :  { %v612_v7 = vrot.slane %v611_v4, 1  ;;  %v659_v8 = vadd.f32 %v658_v5, %v657_v3  ;;  %v799_v5 = vld [vmem:[%s3357_s17] sm:$0xff] }
 0x24c   :  { %v613_v9 = vadd.f32 %v612_v7, %v611_v4  ;;  %v660_v10 = vrot.slane %v659_v8, 1  ;;  %v2626_v4 = vpack.c.bf16 %v904_v60, %v903_v59  ;;  %v800_v7 = vld [vmem:[%s3357_s17 + $0x8] sm:$0xff] }
 0x24e   :  { %v614_v11 = vmul.f32 0.083333336, %v613_v9  ;;  %v661_v12 = vadd.f32 %v660_v10, %v659_v8  ;;  %v2622_v10 = vpack.c.bf16 %v800_v7, %v799_v5 }
 0x250   :  { %v615_v13 = vsub.f32 %v496_v53, %v614_v11  ;;  %v616_v14 = vsub.f32 %v497_v50, %v614_v11  ;;  %v662_v15 = vmul.f32 0.1, %v661_v12  ;;  %v2365_v53 = vld [vmem:[%s2912_s27] ss:$0 sm:$0xff]  ;;  %v905_v12 = vld [vmem:[%s3356_s13 + $0x10] sm:$0xff]  ;;  %s3364_s27 = sld [smem:[#allocation22_spill]] }
 0x252   :  { %v617_v16 = vmul.f32 %v615_v13, %v615_v13  ;;  %v618_v17 = vmul.f32 %v616_v14, %v616_v14  ;;  %v663_v19 = vsub.f32 %v601_v58, %v662_v15  ;;  %v664_v20 = vsub.f32 %v602_v56, %v662_v15  ;;  %v2367_v58 = vld [vmem:[%s3355_s9] ss:$0 sm:$0xff] }
 0x254   :  { %v619_v22 = vsel %vm603_vm13, %v617_v16, 0.0  ;;  %v620_v24 = vsel %vm3330_vm12, %v618_v17, 0.0  ;;  %v665_v25 = vmul.f32 %v663_v19, %v663_v19  ;;  %v666_v26 = vmul.f32 %v664_v20, %v664_v20 }
 0x255   :  { %v621_v27 = vadd.f32 %v620_v24, %v619_v22 }
 0x256   :  { %v667_v28 = vsel %vm651_vm15, %v665_v25, 0.0  ;;  %v668_v29 = vsel %vm653_vm14, %v666_v26, 0.0 }
 0x257   :  { %v622_v30 = vrot.slane %v621_v27, 4  ;;  %v669_v31 = vadd.f32 %v668_v29, %v667_v28 }
 0x259   :  { %v623_v32 = vadd.f32 %v622_v30, %v621_v27  ;;  %v670_v33 = vrot.slane %v669_v31, 4 }
 0x25b   :  { %v624_v34 = vrot.slane %v623_v32, 2  ;;  %v671_v35 = vadd.f32 %v670_v33, %v669_v31  ;;  %v2373_v33 = vld [vmem:[%s3358_s14] ss:$0 sm:$0xff] }
 0x25d   :  { %v625_v36 = vadd.f32 %v624_v34, %v623_v32  ;;  %v672_v37 = vrot.slane %v671_v35, 2  ;;  %v2370_v34 = vld [vmem:[%s3359_s24] ss:$0 sm:$0xff] }
 0x25f   :  { %v626_v38 = vrot.slane %v625_v36, 1  ;;  %v673_v39 = vadd.f32 %v672_v37, %v671_v35 }
 0x261   :  { %v627_v40 = vadd.f32 %v626_v38, %v625_v36  ;;  %v674_v41 = vrot.slane %v673_v39, 1 }
 0x263   :  { %v628_v42 = vmul.f32 0.083333336, %v627_v40  ;;  %v675_v43 = vadd.f32 %v674_v41, %v673_v39 }
 0x265   :  { %v629_v44 = vadd.f32 1e-05, %v628_v42  ;;  %v676_v45 = vmul.f32 0.1, %v675_v43 }
 0x267   :  { %2729 = vrsqrt.f32 %v629_v44  ;;  %v677_v46 = vadd.f32 1e-05, %v676_v45 }
 0x269   :  { %2731 = vrsqrt.f32 %v677_v46 }
 0x271   :  { %v2730_v47 = vpop.eup %2729 }
 0x272   :  { %v631_v49 = vmul.f32 %v2730_v47, %v615_v13  ;;  %v632_v50 = vmul.f32 %v2730_v47, %v616_v14  ;;  %v801_v13 = vld [vmem:[%s3357_s17 + $0x10] sm:$0xff] }
 0x273   :  { %v2732_v51 = vpop.eup %2731 }
 0x274   :  { %v640_v54 = vmul.f32 %v2364_v48, %v631_v49  ;;  %v641_v55 = vmul.f32 %v2364_v48, %v632_v50  ;;  %v679_v56 = vmul.f32 %v2732_v51, %v663_v19  ;;  %v680_v57 = vmul.f32 %v2732_v51, %v664_v20 }
 0x276   :  { %v689_v61 = vmul.f32 %v2366_v52, %v680_v57  ;;  %v688_v62 = vmul.f32 %v2366_v52, %v679_v56  ;;  %v649_v63 = vadd.f32 %v2365_v53, %v640_v54  ;;  %v650_v0 = vadd.f32 %v2365_v53, %v641_v55 }
 0x278   :  { %v698_v1 = vadd.f32 %v2367_v58, %v689_v61  ;;  %v697_v2 = vadd.f32 %v2367_v58, %v688_v62  ;;  %v744_v3 = vpack.c.bf16 %v650_v0, %v649_v63 }
 0x27a   :  { %897 = vrot.lane.b32.xlu1 %v698_v1, %s2818_s21  ;;  %895 = vrot.lane.b32.xlu0 %v697_v2, %s2818_s21  ;;  %v699_v8 = vpack.c.bf16 %v698_v1, %v697_v2  ;;  %v746_v9 = vsel %vm347_vm7, %v744_v3, 0 }
 0x27b   :  { %2507 = vmatpush3.bf16.msra.mxu1 %v746_v9 }
 0x27c   :  { %v701_v11 = vsel %vm292_vm6, %v699_v8, 0  ;;  %2627 = vmatprep.subr.bf16.mxu1 %v2626_v4 }
 0x27d   :  { %2501 = vmatpush3.bf16.msra.mxu0 %v701_v11 }
 0x27e   :  { %793 = vrot.lane.b32.xlu1 %v650_v0, %s2819_s8  ;;  %791 = vrot.lane.b32.xlu0 %v649_v63, %s2819_s8 }
 0x27f   :  { %2509 = vmatmul.mubr.msk.bf16.vlgmr.msra.gmra.mrb[8].mxu1 %vm343_vm11, %v3061_v23  ;;  %2623 = vmatprep.subr.bf16.mxu0 %v2622_v10 }
 0x280   :  { %2503 = vmatmul.mubr.msk.bf16.vlgmr.msra.gmra.mrb[8].mxu0 %vm288_vm10, %v3057_v21  ;;  %2629 = vmatpush3.bf16.msra.mxu1 %v2626_v4 }
 0x281   :  { %2625 = vmatpush3.bf16.msra.mxu0 %v2622_v10  ;;  %2525 = vmatprep.subr.mxu1 %v905_v12 }
 0x282   :  { %2516 = vmatprep.subr.mxu0 %v801_v13 }
 0x284   :  { %2526 = vmatpush3.msra.mxu1 %v905_v12 }
 0x285   :  { %2517 = vmatpush3.msra.mxu0 %v801_v13  ;;  %2536 = vmatprep.subr.bf16.mxu1 %v2813_v6 }
 0x286   :  { %2530 = vmatprep.subr.bf16.mxu0 %v2813_v6 }
 0x2ec   :  { %v898_v14 = vpop.permute.xlu1 %897  ;;  %v896_v15 = vpop.permute.xlu0 %895 }
 0x2f0   :  { %v794_v16 = vpop.permute.xlu1 %793  ;;  %v792_v17 = vpop.permute.xlu0 %791 }
 0x352   :  { %v782_v19 = vpop.f32.mrb[8].mxu1 }
 0x353   :  { %v737_v20 = vpop.f32.mrb[8].mxu0  ;;  %v901_v22 = vsel %vm603_vm13, %v782_v19, %v896_v15  ;;  %v2510_v24 = vpop.f32.mrb[9].mxu1 }
 0x354   :  { %v797_v25 = vsel %vm651_vm15, %v737_v20, %v792_v17  ;;  %v2504_v26 = vpop.f32.mrb[9].mxu0  ;;  %v785_v27 = vpop.f32.mrb[10].mxu1  ;;  %2527 = vmatprep.mubr.msk.f32.mxu1 %vm3329_vm0, %v901_v22 }
 0x355   :  { %v740_v28 = vpop.f32.mrb[10].mxu0  ;;  %v902_v29 = vsel %vm603_vm13, %v785_v27, %v898_v14  ;;  %2518 = vmatprep.mubr.msk.f32.mxu0 %vm3329_vm0, %v797_v25  ;;  %v2511_v30 = vpop.f32.mrb[11].mxu1 }
 0x356   :  { %v798_v31 = vsel %vm651_vm15, %v740_v28, %v794_v16  ;;  %v2505_v32 = vpop.f32.mrb[11].mxu0  ;;  %2528 = vmatmul.mubr.msk.f32.vlgmr.msra.gmra.mrb[6].mxu1 %vm3329_vm0, %v902_v29 }
 0x357   :  { %2519 = vmatmul.mubr.msk.f32.vlgmr.msra.gmra.mrb[6].mxu0 %vm3329_vm0, %v798_v31  ;;  %2538 = vmatprep.mubr.msk.bf16.mxu1 %vm2814_vm4, %v2813_v6 }
 0x358   :  { %2532 = vmatprep.mubr.msk.bf16.mxu0 %vm2814_vm4, %v2813_v6 }
 0x429   :  { %v2529_v35 = vpop.f32.mrb[6].mxu1 }
 0x42a   :  { %v2520_v36 = vpop.f32.mrb[6].mxu0  ;;  %v991_v37 = vadd.f32 %v2529_v35, %v2373_v33  ;;  %v985_v38 = vpop.f32.mrb[7].mxu1 }
 0x42b   :  { %v888_v39 = vadd.f32 %v2520_v36, %v2370_v34  ;;  %v882_v40 = vpop.f32.mrb[7].mxu0  ;;  %v986_v41 = vadd.f32 %v2373_v33, %v985_v38  ;;  %v2378_v38 = vld [vmem:[%s3360_s30] ss:$0 sm:$0xff] }
 0x42c   :  { %v995_v42 = vmax.f32 %v991_v37, 0.0  ;;  %v883_v43 = vadd.f32 %v2370_v34, %v882_v40 }
 0x42d   :  { %v892_v44 = vmax.f32 %v888_v39, 0.0  ;;  %v994_v45 = vmax.f32 %v986_v41, 0.0 }
 0x42e   :  { %v1043_v46 = vsel %vm653_vm14, %v995_v42, 0.0  ;;  %v891_v47 = vmax.f32 %v883_v43, 0.0 }
 0x42f   :  { %v997_v48 = vsel %vm3330_vm12, %v892_v44, 0.0  ;;  %v1042_v49 = vsel %vm651_vm15, %v994_v45, 0.0 }
 0x430   :  { %v996_v50 = vsel %vm603_vm13, %v891_v47, 0.0  ;;  %v1044_v51 = vadd.f32 %v1043_v46, %v1042_v49 }
 0x431   :  { %v998_v52 = vadd.f32 %v997_v48, %v996_v50  ;;  %v2377_v48 = vld [vmem:[%s3363_s20] ss:$0 sm:$0xff] }
 0x432   :  { %v1045_v53 = vrot.slane %v1044_v51, 4 }
 0x433   :  { %v999_v54 = vrot.slane %v998_v52, 4 }
 0x434   :  { %v1046_v55 = vadd.f32 %v1045_v53, %v1044_v51  ;;  %v1188_v51 = vld [vmem:[%s3364_s27] sm:$0xff] }
 0x435   :  { %v1000_v56 = vadd.f32 %v999_v54, %v998_v52  ;;  %v1189_v52 = vld [vmem:[%s3364_s27 + $0x8] sm:$0xff] }
 0x436   :  { %v1047_v57 = vrot.slane %v1046_v55, 2 }
 0x437   :  { %v1001_v58 = vrot.slane %v1000_v56, 2 }
 0x438   :  { %v1048_v59 = vadd.f32 %v1047_v57, %v1046_v55  ;;  %v1291_v57 = vld [vmem:[%s3365_s4] sm:$0xff] }
 0x439   :  { %v1002_v60 = vadd.f32 %v1001_v58, %v1000_v56  ;;  %v1292_v58 = vld [vmem:[%s3365_s4 + $0x8] sm:$0xff] }
 0x43a   :  { %v1049_v61 = vrot.slane %v1048_v59, 1 }
 0x43b   :  { %v1003_v62 = vrot.slane %v1002_v60, 1 }
 0x43c   :  { %v1050_v63 = vadd.f32 %v1049_v61, %v1048_v59 }
 0x43d   :  { %v1004_v0 = vadd.f32 %v1003_v62, %v1002_v60  ;;  %v2630_v60 = vpack.c.bf16 %v1189_v52, %v1188_v51 }
 0x43e   :  { %v1051_v1 = vmul.f32 0.1, %v1050_v63  ;;  %v2634_v63 = vpack.c.bf16 %v1292_v58, %v1291_v57 }
 0x43f   :  { %v1005_v2 = vmul.f32 0.083333336, %v1004_v0 }
 0x440   :  { %v1052_v3 = vsub.f32 %v994_v45, %v1051_v1  ;;  %v1053_v4 = vsub.f32 %v995_v42, %v1051_v1  ;;  %v2376_v42 = vld [vmem:[%s3361_s6] ss:$0 sm:$0xff]  ;;  %v1190_v1 = vld [vmem:[%s3364_s27 + $0x10] sm:$0xff] }
 0x441   :  { %v1006_v5 = vsub.f32 %v891_v47, %v1005_v2  ;;  %v1007_v7 = vsub.f32 %v892_v44, %v1005_v2  ;;  %v2379_v45 = vld [vmem:[%s3362_s12] ss:$0 sm:$0xff]  ;;  %v1293_v2 = vld [vmem:[%s3365_s4 + $0x10] sm:$0xff] }
 0x442   :  { %v1054_v8 = vmul.f32 %v1052_v3, %v1052_v3  ;;  %v1055_v9 = vmul.f32 %v1053_v4, %v1053_v4 }
 0x443   :  { %v1008_v10 = vmul.f32 %v1006_v5, %v1006_v5  ;;  %v1009_v11 = vmul.f32 %v1007_v7, %v1007_v7 }
 0x444   :  { %v1056_v12 = vsel %vm651_vm15, %v1054_v8, 0.0  ;;  %v1057_v13 = vsel %vm653_vm14, %v1055_v9, 0.0 }
 0x445   :  { %v1010_v14 = vsel %vm603_vm13, %v1008_v10, 0.0  ;;  %v1011_v15 = vsel %vm3330_vm12, %v1009_v11, 0.0  ;;  %v1058_v16 = vadd.f32 %v1057_v13, %v1056_v12  ;;  %vm1969_vm12 = vcmask 9216  }
 0x446   :  { %v1012_v17 = vadd.f32 %v1011_v15, %v1010_v14 }
 0x447   :  { %v1059_v19 = vrot.slane %v1058_v16, 4 }
 0x448   :  { %v1013_v20 = vrot.slane %v1012_v17, 4 }
 0x449   :  { %v1060_v22 = vadd.f32 %v1059_v19, %v1058_v16  ;;  %v1390_v19 = vld [vmem:[%s3366_s15] sm:$0xff] }
 0x44a   :  { %v1014_v24 = vadd.f32 %v1013_v20, %v1012_v17  ;;  %v1391_v20 = vld [vmem:[%s3366_s15 + $0x8] sm:$0xff] }
 0x44b   :  { %v1061_v25 = vrot.slane %v1060_v22, 2 }
 0x44c   :  { %v1015_v26 = vrot.slane %v1014_v24, 2 }
 0x44d   :  { %v1062_v27 = vadd.f32 %v1061_v25, %v1060_v22  ;;  %v2638_v22 = vpack.c.bf16 %v1391_v20, %v1390_v19  ;;  %v2382_v25 = vld [vmem:[%s3368_s25] ss:$0 sm:$0xff] }
 0x44e   :  { %v1016_v28 = vadd.f32 %v1015_v26, %v1014_v24  ;;  %v1571_v24 = vld [vmem:[%s3367_s22] sm:$0xff] }
 0x44f   :  { %v1063_v29 = vrot.slane %v1062_v27, 1 }
 0x450   :  { %v1017_v30 = vrot.slane %v1016_v28, 1 }
 0x451   :  { %v1064_v31 = vadd.f32 %v1063_v29, %v1062_v27  ;;  %v2385_v27 = vld [vmem:[%s3369_s28] ss:$0 sm:$0xff] }
 0x452   :  { %v1018_v32 = vadd.f32 %v1017_v30, %v1016_v28 }
 0x453   :  { %v1065_v33 = vmul.f32 0.1, %v1064_v31 }
 0x454   :  { %v1019_v34 = vmul.f32 0.083333336, %v1018_v32 }
 0x455   :  { %v1066_v35 = vadd.f32 1e-05, %v1065_v33 }
 0x456   :  { %v1020_v36 = vadd.f32 1e-05, %v1019_v34 }
 0x457   :  { %2733 = vrsqrt.f32 %v1066_v35 }
 0x458   :  { %2735 = vrsqrt.f32 %v1020_v36 }
 0x461   :  { %v2734_v37 = vpop.eup %2733 }
 0x462   :  { %v2736_v39 = vpop.eup %2735  ;;  %v1068_v40 = vmul.f32 %v2734_v37, %v1052_v3  ;;  %v1069_v41 = vmul.f32 %v2734_v37, %v1053_v4 }
 0x463   :  { %v1022_v43 = vmul.f32 %v2736_v39, %v1006_v5  ;;  %v1023_v44 = vmul.f32 %v2736_v39, %v1007_v7  ;;  %v1482_v39 = vld [vmem:[%s3370_s2] sm:$0xff] }
 0x464   :  { %v1077_v46 = vmul.f32 %v2378_v38, %v1068_v40  ;;  %v1078_v47 = vmul.f32 %v2378_v38, %v1069_v41  ;;  %v1662_v40 = vld [vmem:[%s3012_s1] sm:$0xf]  ;;  %s3373_s1 = sld [smem:[#allocation9_spill]] }
 0x465   :  { %v1032_v49 = vmul.f32 %v2376_v42, %v1023_v44  ;;  %v1031_v50 = vmul.f32 %v2376_v42, %v1022_v43  ;;  %v2388_v41 = vld [vmem:[%s3371_s7] ss:$0 sm:$0xff] }
 0x466   :  { %v1086_v53 = vadd.f32 %v2379_v45, %v1077_v46  ;;  %v1087_v54 = vadd.f32 %v2379_v45, %v1078_v47  ;;  %v2394_v46 = vld [vmem:[%s3372_s10] ss:$0 sm:$0xff] }
 0x467   :  { %v1041_v55 = vadd.f32 %v2377_v48, %v1032_v49  ;;  %v1040_v56 = vadd.f32 %v2377_v48, %v1031_v50 }
 0x468   :  { %v1088_v59 = vpack.c.bf16 %v1087_v54, %v1086_v53 }
 0x469   :  { %1182 = vrot.lane.b32.xlu1 %v1041_v55, %s2819_s8  ;;  %1180 = vrot.lane.b32.xlu0 %v1040_v56, %s2819_s8  ;;  %v1133_v61 = vpack.c.bf16 %v1041_v55, %v1040_v56  ;;  %v2820_v55 = vmov 0   ;;  %v2391_v56 = vld [vmem:[#allocation4] ss:$0 sm:$0xff] }
 0x46a   :  { %v1090_v62 = vsel %vm292_vm6, %v1088_v59, 0  ;;  %2711 = vset.pattern.permute.xlu1 %v2820_v55  ;;  %2712 = vset.pattern.permute.xlu0 %v2820_v55 }
 0x46b   :  { %2531 = vmatpush3.bf16.msra.mxu0 %v1090_v62  ;;  %v1135_v0 = vsel %vm347_vm7, %v1133_v61, 0  ;;  %v2397_v61 = vld [vmem:[#allocation5] ss:$0 sm:$0xff]  ;;  %vm1770_vm7 = vcmask 15360  }
 0x46c   :  { %2537 = vmatpush3.bf16.msra.mxu1 %v1135_v0  ;;  %2631 = vmatprep.subr.bf16.mxu0 %v2630_v60 }
 0x46d   :  { %1285 = vrot.lane.b32.xlu1 %v1087_v54, %s2818_s21  ;;  %1283 = vrot.lane.b32.xlu0 %v1086_v53, %s2818_s21 }
 0x46e   :  { %2533 = vmatmul.mubr.msk.bf16.vlgmr.msra.gmra.mrb[12].mxu0 %vm288_vm10, %v3057_v21  ;;  %2635 = vmatprep.subr.bf16.mxu1 %v2634_v63 }
 0x46f   :  { %2539 = vmatmul.mubr.msk.bf16.vlgmr.msra.gmra.mrb[12].mxu1 %vm343_vm11, %v3061_v23  ;;  %2633 = vmatpush3.bf16.msra.mxu0 %v2630_v60 }
 0x470   :  { %2637 = vmatpush3.bf16.msra.mxu1 %v2634_v63  ;;  %2546 = vmatprep.subr.mxu0 %v1190_v1 }
 0x471   :  { %2555 = vmatprep.subr.mxu1 %v1293_v2 }
 0x473   :  { %2547 = vmatpush3.msra.mxu0 %v1190_v1 }
 0x474   :  { %2556 = vmatpush3.msra.mxu1 %v1293_v2  ;;  %2639 = vmatprep.subr.bf16.mxu0 %v2638_v22  ;;  %v3209_v2 = vld [vmem:[%s3373_s1 + $0x8] sm:$0xf] }
 0x475   :  { %2567 = vmatprep.subr.mxu1 %v1482_v39  ;;  %vm1757_vm3 = vcmp.gt.f32.partialorder %v3209_v2, 0.0 }
 0x4db   :  { %v1183_v3 = vpop.permute.xlu1 %1182  ;;  %v1181_v4 = vpop.permute.xlu0 %1180 }
 0x4df   :  { %v1286_v5 = vpop.permute.xlu1 %1285  ;;  %v1284_v7 = vpop.permute.xlu0 %1283 }
 0x541   :  { %v1126_v8 = vpop.f32.mrb[12].mxu0 }
 0x542   :  { %v1186_v21 = vsel %vm651_vm15, %v1126_v8, %v1181_v4  ;;  %v1171_v9 = vpop.f32.mrb[12].mxu1  ;;  %v2534_v10 = vpop.f32.mrb[13].mxu0 }
 0x543   :  { %v1289_v23 = vsel %vm603_vm13, %v1171_v9, %v1284_v7  ;;  %v2540_v11 = vpop.f32.mrb[13].mxu1  ;;  %v1129_v12 = vpop.f32.mrb[14].mxu0  ;;  %2548 = vmatprep.mubr.msk.f32.mxu0 %vm3329_vm0, %v1186_v21  ;;  %v3220_v7 = vld [vmem:[%s3374_s11] sm:$0xff] }
 0x544   :  { %v1187_v13 = vsel %vm651_vm15, %v1129_v12, %v1183_v3  ;;  %v1174_v14 = vpop.f32.mrb[14].mxu1  ;;  %2557 = vmatprep.mubr.msk.f32.mxu1 %vm3329_vm0, %v1289_v23  ;;  %v2535_v15 = vpop.f32.mrb[15].mxu0  ;;  %v3212_v3 = vld [vmem:[%s3373_s1] sm:$0xff] }
 0x545   :  { %v1290_v16 = vsel %vm603_vm13, %v1174_v14, %v1286_v5  ;;  %v2541_v17 = vpop.f32.mrb[15].mxu1  ;;  %2549 = vmatmul.mubr.msk.f32.vlgmr.msra.gmra.mrb[16].mxu0 %vm3329_vm0, %v1187_v13  ;;  %vm1756_vm6 = vcmp.gt.f32.partialorder %v3212_v3, 0.0  ;;  %v3217_v5 = vld [vmem:[%s3374_s11 + $0x8] sm:$0x3] }
 0x546   :  { %2558 = vmatmul.mubr.msk.f32.vlgmr.msra.gmra.mrb[16].mxu1 %vm3329_vm0, %v1290_v16  ;;  %2641 = vmatpush3.bf16.msra.mxu0 %v2638_v22  ;;  %vm1954_vm0 = vcmp.gt.f32.partialorder %v3220_v7, 0.0 }
 0x547   :  { %2572 = vmatprep.subr.mxu0 %v1571_v24  ;;  %2568 = vmatpush3.msra.mxu1 %v1482_v39 }
 0x548   :  { %2577 = vmatprep.subr.msk.mxu1 %vm1677_vm1, %v1662_v40 }
 0x618   :  { %v2550_v26 = vpop.f32.mrb[16].mxu0 }
 0x619   :  { %v1276_v28 = vadd.f32 %v2550_v26, %v2382_v25  ;;  %v2559_v29 = vpop.f32.mrb[16].mxu1  ;;  %v1270_v30 = vpop.f32.mrb[17].mxu0 }
 0x61a   :  { %v1271_v31 = vadd.f32 %v2382_v25, %v1270_v30  ;;  %v1373_v32 = vpop.f32.mrb[17].mxu1  ;;  %v1379_v36 = vadd.f32 %v2559_v29, %v2385_v27 }
 0x61b   :  { %v1374_v33 = vadd.f32 %v2385_v27, %v1373_v32  ;;  %v3180_v35 = vmax.f32 %v1276_v28, 0.0 }
 0x61c   :  { %v3178_v34 = vmax.f32 %v1271_v31, 0.0  ;;  %v3190_v38 = vmax.f32 %v1379_v36, 0.0 }
 0x61d   :  { %v3182_v37 = vmax.f32 %v1374_v33, 0.0 }
 0x61e   :  { %2564 = vmatprep.mubr.msk.f32.mxu0 %vm603_vm13, %v3178_v34 }
 0x61f   :  { %2565 = vmatmul.mubr.msk.f32.vlgmr.msra.gmra.mrb[18].mxu0 %vm603_vm13, %v3180_v35 }
 0x620   :  { %2573 = vmatpush3.msra.mxu0 %v1571_v24  ;;  %2574 = vmatprep.mubr.msk.f32.mxu0 %vm651_vm15, %v3182_v37 }
 0x623   :  { %2575 = vmatmul.mubr.msk.f32.vlgmr.msra.gmra.mrb[20].mxu0 %vm651_vm15, %v3190_v38 }
 0x624   :  { %2586 = vmatprep.mubr.msk.f32.mxu0 %vm2814_vm4, %v2813_v6 }
 0x6f2   :  { %v2566_v42 = vpop.f32.mrb[18].mxu0 }
 0x6f3   :  { %v1477_v43 = vadd.f32 %v2566_v42, %v2388_v41  ;;  %v1471_v44 = vpop.f32.mrb[19].mxu0 }
 0x6f4   :  { %v1472_v45 = vadd.f32 %v2388_v41, %v1471_v44 }
 0x6f5   :  { %v1481_v49 = vmax.f32 %v1477_v43, 0.0 }
 0x6f6   :  { %v1480_v47 = vmax.f32 %v1472_v45, 0.0  ;;  %v2576_v48 = vpop.f32.mrb[20].mxu0 }
 0x6f7   :  { %v1657_v50 = vadd.f32 %v2576_v48, %v2394_v46  ;;  %v1651_v51 = vpop.f32.mrb[21].mxu0 }
 0x6f8   :  { %v1652_v52 = vadd.f32 %v2394_v46, %v1651_v51  ;;  %2569 = vmatprep.mubr.msk.f32.mxu1 %vm651_vm15, %v1480_v47  ;;  %v2161_v46 = vsel %vm1969_vm12, %v3217_v5, 0.0  ;;  %v2160_v47 = vsel %vm1770_vm7, %v3220_v7, 0.0 }
 0x6f9   :  { %2570 = vmatmul.mubr.msk.f32.vlgmr.msra.gmra.mrb[18].mxu1 %vm651_vm15, %v1481_v49  ;;  %v1661_v54 = vmax.f32 %v1657_v50, 0.0  ;;  %v2162_v51 = vadd.f32 %v2161_v46, %v2160_v47 }
 0x6fa   :  { %v1660_v53 = vmax.f32 %v1652_v52, 0.0  ;;  %2578 = vmatpush3.msk.msra.mxu1 %vm1677_vm1, %v1662_v40 }
 0x6fc   :  { %2579 = vmatprep.mubr.msk.f32.mxu1 %vm1670_vm2, %v1660_v53 }
 0x6fd   :  { %2580 = vmatmul.mubr.msk.f32.vlgmr.msra.gmra.mrb[20].mxu1 %vm1670_vm2, %v1661_v54  ;;  %vm1955_vm2 = vcmp.gt.f32.partialorder %v3217_v5, 0.0 }
 0x6fe   :  { %2593 = vmatprep.mubr.msk.f32.mxu1 %vm2814_vm4, %v2813_v6 }
 0x7cc   :  { %v2571_v57 = vpop.f32.mrb[18].mxu1 }
 0x7cd   :  { %v1568_v58 = vadd.f32 %v2571_v57, %v2391_v56  ;;  %v1562_v59 = vpop.f32.mrb[19].mxu1 }
 0x7ce   :  { %v1563_v60 = vadd.f32 %v2391_v56, %v1562_v59  ;;  %v2163_v59 = vrot.slane %v2162_v51, 4 }
 0x7cf   :  { %1765 = vperm.xlu1 %2711, %v1568_v58  }
 0x7d0   :  { %1760 = vperm.xlu0 %2712, %v1563_v60   ;;  %v2581_v62 = vpop.f32.mrb[20].mxu1 }
 0x7d1   :  { %v1753_v63 = vadd.f32 %v2581_v62, %v2397_v61  ;;  %v1747_v0 = vpop.f32.mrb[21].mxu1 }
 0x7d2   :  { %v1748_v1 = vadd.f32 %v2397_v61, %v1747_v0 }
 0x7d4   :  { %1963 = vperm.xlu0 %2712, %v1753_v63   ;;  %1958 = vperm.xlu1 %2711, %v1748_v1   ;;  %v2164_v63 = vadd.f32 %v2163_v59, %v2162_v51 }
 0x7d6   :  { %v2165_v0 = vrot.slane %v2164_v63, 2 }
 0x7d8   :  { %v2166_v1 = vadd.f32 %v2165_v0, %v2164_v63 }
 0x84e   :  { %v1766_v4 = vpop.permute.xlu1 %1765 }
 0x84f   :  { %v1769_v8 = vsel %vm1757_vm3, %v1766_v4, -1e+30  ;;  %v1761_v21 = vpop.permute.xlu0 %1760  ;;  %v2821_v4 = vmov 0.0|0.0  }
 0x850   :  { %v1773_v9 = vsel %vm1772_vm5, %v1769_v8, -inf  ;;  %v1768_v10 = vsel %vm1756_vm6, %v1761_v21, -1e+30  ;;  %2646 = vmatprep.subr.bf16.mxu1 %v2821_v4  ;;  %2642 = vmatprep.subr.bf16.mxu0 %v2821_v4  ;;  %v2198_v21 = vsel %vm1955_vm2, 1, %v2820_v55 }
 0x851   :  { %v1771_v23 = vsel %vm1770_vm7, %v1768_v10, -inf }
 0x852   :  { %v1774_v11 = vmax.f32 %v1771_v23, %v1773_v9  ;;  %v2822_v23 = vmov 1  }
 0x853   :  { %v1964_v12 = vpop.permute.xlu0 %1963  ;;  %v1959_v13 = vpop.permute.xlu1 %1958 }
 0x854   :  { %v1775_v14 = vrot.slane %v1774_v11, 4  ;;  %v1967_v15 = vsel %vm1955_vm2, %v1964_v12, -1e+30  ;;  %v1966_v16 = vsel %vm1954_vm0, %v1959_v13, -1e+30 }
 0x855   :  { %v1970_v17 = vsel %vm1969_vm12, %v1967_v15, -inf  ;;  %v1968_v19 = vsel %vm1770_vm7, %v1966_v16, -inf }
 0x856   :  { %v1776_v20 = vmax.f32 %v1774_v11, %v1775_v14  ;;  %v1971_v22 = vmax.f32 %v1968_v19, %v1970_v17 }
 0x858   :  { %v1777_v24 = vrot.slane %v1776_v20, 2  ;;  %v1972_v25 = vrot.slane %v1971_v22, 4 }
 0x85a   :  { %v1778_v26 = vmax.f32 %v1776_v20, %v1777_v24  ;;  %v1973_v27 = vmax.f32 %v1971_v22, %v1972_v25 }
 0x85c   :  { %v1779_v28 = vrot.slane %v1778_v26, 1  ;;  %v1974_v29 = vrot.slane %v1973_v27, 2 }
 0x85e   :  { %v1780_v30 = vmax.f32 %v1778_v26, %v1779_v28  ;;  %v1975_v31 = vmax.f32 %v1973_v27, %v1974_v29  ;;  %v1389_v26 = vld [vmem:[%s3376_s3] sm:$0x3] }
 0x860   :  { %v1781_v32 = vsub.f32 %v1768_v10, %v1780_v30  ;;  %v1782_v33 = vsub.f32 %v1769_v8, %v1780_v30  ;;  %v1976_v36 = vrot.slane %v1975_v31, 1  ;;  %v2167_v8 = vrot.slane %v2166_v1, 1 }
 0x861   :  { %v2197_v10 = vsel %vm1954_vm0, 1, %v2820_v55  ;;  %vm2644_vm0 = vmpackc.low %vm1677_vm1, %vm2816_vm8 }
 0x862   :  { %v1783_v39 = vmul.f32 1.442695, %v1781_v32  ;;  %v1785_v40 = vmul.f32 1.442695, %v1782_v33  ;;  %v1977_v41 = vmax.f32 %v1975_v31, %v1976_v36  ;;  %v2168_v9 = vadd.f32 %v2167_v8, %v2166_v1 }
 0x864   :  { %2737 = vpow2.f32 %v1783_v39  ;;  %v1978_v42 = vsub.f32 %v1966_v16, %v1977_v41  ;;  %v1979_v43 = vsub.f32 %v1967_v15, %v1977_v41  ;;  %v1388_v16 = vld [vmem:[%s3375_s16] sm:$0x3]  ;;  %v2151_v41 = vsel %vm1770_vm7, %v3212_v3, 0.0 }
 0x865   :  { %2739 = vpow2.f32 %v1785_v40  ;;  %v2152_v40 = vsel %vm1772_vm5, %v3209_v2, 0.0 }
 0x866   :  { %v1980_v44 = vmul.f32 1.442695, %v1978_v42  ;;  %v1982_v45 = vmul.f32 1.442695, %v1979_v43 }
 0x868   :  { %2741 = vpow2.f32 %v1980_v44 }
 0x869   :  { %2743 = vpow2.f32 %v1982_v45  ;;  %v2153_v45 = vadd.f32 %v2152_v40, %v2151_v41 }
 0x86e   :  { %v2738_v48 = vpop.eup %2737 }
 0x86f   :  { %v2740_v49 = vpop.eup %2739  ;;  %v1787_v50 = vmul.f32 %v2738_v48, %v3212_v3 }
 0x870   :  { %v1788_v52 = vmul.f32 %v2740_v49, %v3209_v2  ;;  %v2154_v49 = vrot.slane %v2153_v45, 4 }
 0x871   :  { %v1789_v53 = vsel %vm1770_vm7, %v1787_v50, 0.0 }
 0x872   :  { %v2742_v54 = vpop.eup %2741  ;;  %v1792_v56 = vsel %vm1772_vm5, %v1788_v52, 0.0  ;;  %1790 = vadd.xlane.f32.xlu1 %v1789_v53 }
 0x873   :  { %v2744_v57 = vpop.eup %2743  ;;  %1793 = vadd.xlane.f32.xlu0 %v1792_v56  ;;  %v1984_v58 = vmul.f32 %v2742_v54, %v3220_v7  ;;  %v2155_v56 = vadd.f32 %v2154_v49, %v2153_v45 }
 0x874   :  { %v1985_v60 = vmul.f32 %v2744_v57, %v3217_v5 }
 0x875   :  { %v1986_v61 = vsel %vm1770_vm7, %v1984_v58, 0.0  ;;  %v2156_v59 = vrot.slane %v2155_v56, 2  ;;  %vm3377_vm7 = vcmask 125952  }
 0x876   :  { %v1989_v62 = vsel %vm1969_vm12, %v1985_v60, 0.0  ;;  %vm2218_vm12 = vcmp.gt.f32.partialorder %v2168_v9, 0.0 }
 0x877   :  { %1990 = vadd.xlane.f32.xlu1 %v1989_v62  ;;  %1987 = vadd.xlane.f32.xlu0 %v1986_v61  ;;  %v2219_v11 = vsel %vm2218_vm12, 1, %v2820_v55  ;;  %vm3378_vm12 = vmmov %vm3377_vm7 }
 0x888   :  { %2203 = vperm.xlu1 %2711, %v2198_v21  }
 0x88c   :  { %2713 = vset.pattern.permute.xlu1 %v2822_v23 }
 0x88d   :  { %2250 = vperm.xlu1 %2713, %v2197_v10   ;;  %2200 = vperm.xlu0 %2712, %v2197_v10  }
 0x891   :  { %2714 = vset.pattern.permute.xlu0 %v2822_v23  ;;  %2715 = vset.pattern.permute.xlu1 %v2820_v55 }
 0x892   :  { %2253 = vperm.xlu0 %2714, %v2198_v21   ;;  %2221 = vperm.xlu1 %2715, %v2219_v11   ;;  %v2170_v21 = vsel %vm1757_vm3, 1, %v2820_v55 }
 0x896   :  { %2716 = vset.pattern.permute.xlu1 %v2822_v23  ;;  %2717 = vset.pattern.permute.xlu0 %v2820_v55 }
 0x897   :  { %2269 = vperm.xlu1 %2716, %v2219_v11  }
 0x89b   :  { %2718 = vset.pattern.permute.xlu1 %v2820_v55 }
 0x8ff   :  { %v1791_v5 = vpop.xlane.xlu1 %1790 }
 0x900   :  { %v1794_v7 = vpop.xlane.xlu0 %1793  ;;  %v1795_v12 = vmul.f32 %v1791_v5, %v3178_v34 }
 0x901   :  { %v1796_v13 = vmul.f32 %v1794_v7, %v3180_v35  ;;  %v2647_v14 = vpack.c.bf16 %v1794_v7, %v1791_v5 }
 0x903   :  { %v2643_v15 = vpack.c.bf16 %v1796_v13, %v1795_v12  ;;  %2649 = vmatpush3.bf16.msk.msra.mxu1 %vm2644_vm0, %v2647_v14  ;;  %v2169_v14 = vsel %vm1756_vm6, 1, %v2820_v55 }
 0x904   :  { %v1988_v17 = vpop.xlane.xlu0 %1987  ;;  %v1991_v19 = vpop.xlane.xlu1 %1990  ;;  %2654 = vmatprep.subr.bf16.mxu1 %v2821_v4 }
 0x905   :  { %v1992_v20 = vmul.f32 %v1988_v17, %v3182_v37  ;;  %v1993_v22 = vmul.f32 %v1991_v19, %v3190_v38  ;;  %v2655_v24 = vpack.c.bf16 %v1991_v19, %v1988_v17  ;;  %2645 = vmatpush3.bf16.msk.msra.mxu0 %vm2644_vm0, %v2643_v15 }
 0x906   :  { %2594 = vmatmul.mubr.msk.f32.vlgmr.msra.gmra.mrb[22].mxu1 %vm343_vm11, %v1388_v16  ;;  %2650 = vmatprep.subr.bf16.mxu0 %v2821_v4  ;;  %v2157_v4 = vadd.f32 %v2156_v59, %v2155_v56 }
 0x907   :  { %v2651_v25 = vpack.c.bf16 %v1993_v22, %v1992_v20  ;;  %2657 = vmatpush3.bf16.msk.msra.mxu1 %vm3051_vm9, %v2655_v24  ;;  %2607 = vmatprep.mubr.msk.f32.mxu1 %vm2814_vm4, %v2813_v6 }
 0x908   :  { %2587 = vmatmul.mubr.msk.f32.vlgmr.msra.gmra.mrb[22].mxu0 %vm343_vm11, %v1388_v16  ;;  %v2204_v28 = vpop.permute.xlu1 %2203  ;;  %v2158_v12 = vrot.slane %v2157_v4, 1 }
 0x909   :  { %2653 = vmatpush3.bf16.msk.msra.mxu0 %vm3051_vm9, %v2651_v25  ;;  %2600 = vmatprep.mubr.msk.f32.mxu0 %vm2814_vm4, %v2813_v6  ;;  %vm2206_vm11 = vcmp.eq.s32.totalorder %v2204_v28, 1 }
 0x90a   :  { %2608 = vmatmul.mubr.msk.f32.vlgmr.msra.gmra.mrb[24].mxu1 %vm288_vm10, %v1389_v26  ;;  %v2208_v33 = vsel %vm2206_vm11, %v3190_v38, -1e+30  ;;  %v2159_v2 = vadd.f32 %v2158_v12, %v2157_v4  ;;  %vm3379_vm11 = vcmask 195584  }
 0x90b   :  { %v2210_v43 = vsel %vm653_vm14, %v2208_v33, -inf }
 0x90c   :  { %2601 = vmatmul.mubr.msk.f32.vlgmr.msra.gmra.mrb[24].mxu0 %vm288_vm10, %v1389_v26  ;;  %v2201_v27 = vpop.permute.xlu0 %2200  ;;  %v2251_v30 = vpop.permute.xlu1 %2250  ;;  %vm2273_vm10 = vcmask 1040384  }
 0x90d   :  { %vm2205_vm1 = vcmp.eq.s32.totalorder %v2201_v27, 1  ;;  %vm2255_vm2 = vcmp.eq.s32.totalorder %v2251_v30, 1 }
 0x90e   :  { %v2207_v18 = vsel %vm2205_vm1, %v3182_v37, -1e+30  ;;  %v2257_v32 = vsel %vm2255_vm2, %v3182_v37, -1e+30  ;;  %vm2290_vm1 = vcmask 326656   ;;  %vm2292_vm2 = vcmask 386048  }
 0x90f   :  { %v2209_v36 = vsel %vm651_vm15, %v2207_v18, -inf  ;;  %v2259_v39 = vsel %vm651_vm15, %v2257_v32, -inf }
 0x910   :  { %v2211_v44 = vmax.f32 %v2209_v36, %v2210_v43 }
 0x911   :  { %v2254_v29 = vpop.permute.xlu0 %2253  ;;  %v2222_v60 = vpop.permute.xlu1 %2221 }
 0x912   :  { %vm2256_vm8 = vcmp.eq.s32.totalorder %v2254_v29, 1  ;;  %v2212_v47 = vrot.slane %v2211_v44, 4  ;;  %vm2223_vm9 = vcmp.eq.s32.totalorder %v2222_v60, 1 }
 0x913   :  { %v2258_v31 = vsel %vm2256_vm8, %v3190_v38, -1e+30 }
 0x914   :  { %v2260_v6 = vsel %vm653_vm14, %v2258_v31, -inf  ;;  %v2213_v52 = vmax.f32 %v2211_v44, %v2212_v47  ;;  %vm2190_vm14 = vcmp.gt.f32.partialorder %v2159_v2, 0.0 }
 0x915   :  { %v2261_v42 = vmax.f32 %v2259_v39, %v2260_v6  ;;  %v2191_v3 = vsel %vm2190_vm14, 1, %v2820_v55 }
 0x916   :  { %v2214_v58 = vrot.slane %v2213_v52, 2  ;;  %v2270_v5 = vpop.permute.xlu1 %2269 }
 0x917   :  { %v2262_v37 = vrot.slane %v2261_v42, 4  ;;  %vm2271_vm4 = vcmp.eq.s32.totalorder %v2270_v5, 1 }
 0x918   :  { %v2215_v0 = vmax.f32 %v2213_v52, %v2214_v58 }
 0x919   :  { %v2263_v50 = vmax.f32 %v2261_v42, %v2262_v37 }
 0x91a   :  { %v2216_v11 = vrot.slane %v2215_v0, 1 }
 0x91b   :  { %v2264_v57 = vrot.slane %v2263_v50, 2 }
 0x91c   :  { %v2217_v15 = vmax.f32 %v2215_v0, %v2216_v11 }
 0x91d   :  { %v2265_v61 = vmax.f32 %v2263_v50, %v2264_v57 }
 0x91e   :  { %v2224_v17 = vsel %vm2223_vm9, %v2217_v15, 0.0 }
 0x91f   :  { %v2266_v8 = vrot.slane %v2265_v61, 1 }
 0x921   :  { %v2267_v13 = vmax.f32 %v2265_v61, %v2266_v8 }
 0x923   :  { %v2272_v16 = vsel %vm2271_vm4, %v2267_v13, 0.0 }
 0x924   :  { %v2275_v19 = vsel %vm2273_vm10, %v2224_v17, %v2272_v16 }
 0x9d9   :  { %v1942_v46 = vpop.f32.mrb[22].mxu1 }
 0x9da   :  { %v1946_v48 = vmax.f32 %v1942_v46, 1e-12  ;;  %v2595_v38 = vpop.f32.mrb[23].mxu1 }
 0x9db   :  { %v1869_v62 = vpop.f32.mrb[22].mxu0 }
 0x9dc   :  { %2745 = vrcp.f32 %v1946_v48  ;;  %v2588_v1 = vpop.f32.mrb[23].mxu0 }
 0x9dd   :  { %v2139_v51 = vpop.f32.mrb[24].mxu1 }
 0x9de   :  { %v2143_v53 = vmax.f32 %v2139_v51, 1e-12  ;;  %v2609_v54 = vpop.f32.mrb[25].mxu1 }
 0x9df   :  { %v2066_v9 = vpop.f32.mrb[24].mxu0 }
 0x9e0   :  { %2747 = vrcp.f32 %v2143_v53  ;;  %v2602_v7 = vpop.f32.mrb[25].mxu0 }
 0x9e6   :  { %v2746_v63 = vpop.eup %2745 }
 0x9e7   :  { %1950 = vperm.xlu0 %2717, %v2746_v63  }
 0x9ea   :  { %v2748_v10 = vpop.eup %2747 }
 0x9eb   :  { %2175 = vperm.xlu0 %2717, %v2170_v21   ;;  %2147 = vperm.xlu1 %2718, %v2748_v10  }
 0x9ef   :  { %2720 = vset.pattern.permute.xlu0 %v2822_v23  ;;  %2172 = vperm.xlu1 %2718, %v2169_v14  }
 0x9f0   :  { %2229 = vperm.xlu0 %2720, %v2170_v21  }
 0x9f3   :  { %2719 = vset.pattern.permute.xlu1 %v2822_v23 }
 0x9f4   :  { %2226 = vperm.xlu1 %2719, %v2169_v14   ;;  %2277 = vrot.lane.b32.xlu0 %v2275_v19, %s2818_s21 }
 0x9f8   :  { %2721 = vset.pattern.permute.xlu1 %v2820_v55 }
 0x9f9   :  { %2193 = vperm.xlu1 %2721, %v2191_v3  }
 0x9fd   :  { %2722 = vset.pattern.permute.xlu1 %v2822_v23 }
 0x9fe   :  { %2245 = vperm.xlu1 %2722, %v2191_v3  }
 0xa66   :  { %v1951_v20 = vpop.permute.xlu0 %1950 }
 0xa67   :  { %v1953_v22 = vmul.f32 %v1951_v20, %v1869_v62 }
 0xa69   :  { %2281 = vrot.lane.b32.xlu1 %v1953_v22, %s2823_s18 }
 0xa6a   :  { %v2148_v24 = vpop.permute.xlu1 %2147  ;;  %v2176_v27 = vpop.permute.xlu0 %2175 }
 0xa6b   :  { %v2150_v25 = vmul.f32 %v2148_v24, %v2066_v9  ;;  %vm2178_vm6 = vcmp.eq.s32.totalorder %v2176_v27, 1 }
 0xa6c   :  { %v2180_v18 = vsel %vm2178_vm6, %v3180_v35, -1e+30 }
 0xa6d   :  { %2285 = vrot.lane.b32.xlu0 %v2150_v25, %s2824_s23  ;;  %v2182_v36 = vsel %vm3378_vm12, %v2180_v18, -inf }
 0xa6e   :  { %v2173_v26 = vpop.permute.xlu1 %2172 }
 0xa6f   :  { %v2230_v29 = vpop.permute.xlu0 %2229  ;;  %vm2177_vm3 = vcmp.eq.s32.totalorder %v2173_v26, 1 }
 0xa70   :  { %vm2232_vm5 = vcmp.eq.s32.totalorder %v2230_v29, 1  ;;  %v2179_v23 = vsel %vm2177_vm3, %v3178_v34, -1e+30 }
 0xa71   :  { %v2234_v30 = vsel %vm2232_vm5, %v3180_v35, -1e+30  ;;  %v2181_v32 = vsel %vm603_vm13, %v2179_v23, -inf }
 0xa72   :  { %v2236_v6 = vsel %vm3377_vm7, %v2234_v30, -inf  ;;  %v2183_v39 = vmax.f32 %v2181_v32, %v2182_v36 }
 0xa73   :  { %v2227_v28 = vpop.permute.xlu1 %2226  ;;  %v2278_v52 = vpop.permute.xlu0 %2277 }
 0xa74   :  { %vm2231_vm15 = vcmp.eq.s32.totalorder %v2227_v28, 1  ;;  %v2184_v41 = vrot.slane %v2183_v39, 4 }
 0xa75   :  { %v2233_v55 = vsel %vm2231_vm15, %v3178_v34, -1e+30 }
 0xa76   :  { %v2235_v31 = vsel %vm603_vm13, %v2233_v55, -inf  ;;  %v2185_v43 = vmax.f32 %v2183_v39, %v2184_v41 }
 0xa77   :  { %v2237_v33 = vmax.f32 %v2235_v31, %v2236_v6 }
 0xa78   :  { %v2186_v34 = vrot.slane %v2185_v43, 2  ;;  %v2194_v45 = vpop.permute.xlu1 %2193 }
 0xa79   :  { %v2238_v40 = vrot.slane %v2237_v33, 4  ;;  %vm2195_vm8 = vcmp.eq.s32.totalorder %v2194_v45, 1 }
 0xa7a   :  { %v2187_v46 = vmax.f32 %v2185_v43, %v2186_v34 }
 0xa7b   :  { %v2239_v42 = vmax.f32 %v2237_v33, %v2238_v40 }
 0xa7c   :  { %v2188_v48 = vrot.slane %v2187_v46, 1 }
 0xa7d   :  { %v2240_v44 = vrot.slane %v2239_v42, 2  ;;  %v2246_v35 = vpop.permute.xlu1 %2245 }
 0xa7e   :  { %vm2247_vm0 = vcmp.eq.s32.totalorder %v2246_v35, 1  ;;  %v2189_v49 = vmax.f32 %v2187_v46, %v2188_v48 }
 0xa7f   :  { %v2241_v37 = vmax.f32 %v2239_v42, %v2240_v44 }
 0xa80   :  { %v2196_v51 = vsel %vm2195_vm8, %v2189_v49, 0.0 }
 0xa81   :  { %v2242_v47 = vrot.slane %v2241_v37, 1 }
 0xa83   :  { %v2243_v38 = vmax.f32 %v2241_v37, %v2242_v47 }
 0xa85   :  { %v2248_v50 = vsel %vm2247_vm0, %v2243_v38, 0.0 }
 0xa86   :  { %v2274_v53 = vsel %vm2273_vm10, %v2196_v51, %v2248_v50 }
 0xa87   :  { %v2288_v56 = vsel %vm603_vm13, %v2274_v53, %v2278_v52 }
 0xadb   :  { %v2282_v54 = vpop.permute.xlu1 %2281 }
 0xadc   :  { %v2289_v57 = vsel %vm3379_vm11, %v2288_v56, %v2282_v54 }
 0xadf   :  { %v2286_v58 = vpop.permute.xlu0 %2285 }
 0xae0   :  { %v2291_v59 = vsel %vm2290_vm1, %v2289_v57, %v2286_v58 }
 0xae1   :  { %2293 = vst.msk [vmem:[#allocation6] sm:$0x3] %vm2292_vm2, %v2291_v59 }
 0xae2   :  { %2760 = shalt.err (!%p2757_p4)
}
 0xae3   :  { %s2761_s5 = scalar_lea.hbm %s3017_s29, 32 }
 0xae4   :  { %p2762_p5 = scmp.ne.s32.totalorder %s3017_s29, %s2761_s5  ;;  %p2765_p6 = scmp.lt.u32.totalorder %s2761_s5, %s3017_s29 }
 0xae6   :  { %p2767_p7 = pnand %p2765_p6, %p2762_p5 }
 0xae8   :  { %2770 = shalt.err (!%p2767_p7)
}
 0xae9   :  { %2303 = dma.vmem_to_hbm [thread:$0]  %s2301_s26, 32, %s3017_s29, [#allocation7]  }
 0xaea   :  { %2771 = dma.done.wait [#allocation7], 32  }
 0xaeb   :  { %2772 = vsyncadd [#allocation7], 4294967264 }
 0xaec   :  { %2307 = vsyncpa [#allocation7], 1 }

</bundles_post_ra>
